<compile_context>
chip_gen: v7x
topology: tpu7x:2x2x1
jax: 0.10.0
libtpu: 0.0.40
codegen_flags: <defaults>
</compile_context>

<pallas_src>
import numpy as np
import jax
import jax.numpy as jnp
from jax.experimental import pallas as pl
from jax.experimental.pallas import tpu as pltpu


# --------------------------------------------------------------------------
# Pallas kernels
# --------------------------------------------------------------------------
def _sigmoid(z):
    # single-transcendental sigmoid (one EUP tanh instead of exp + reciprocal)
    return 0.5 * jnp.tanh(0.5 * z) + 0.5


def _run_bilstm(x_ref, wf_ref, bf_ref, wb_ref, bb_ref, hs_f, hs_b):
    """Fused bidirectional LSTM scan over the full sequence resident in VMEM.

    x_ref        : (T, B, Din)  time-major input
    wf/wb_ref    : (Din+H, 4H)  stacked [W_ih^T ; W_hh^T], fwd / bwd direction
    bf/bb_ref    : (1, 4H)      b_ih + b_hh, fwd / bwd direction
    hs_f, hs_b   : (T, B, H)    VMEM scratch for per-step hidden states
    """
    T, B, _ = x_ref.shape
    H = hs_f.shape[-1]
    wf = wf_ref[...]
    wb = wb_ref[...]
    bf = bf_ref[...]
    bb = bb_ref[...]

    def cell(x_t, h, c, w, b):
        # fused [x | h] @ [W_ih^T ; W_hh^T]: one MXU push per direction per step
        xh = jnp.concatenate([x_t, h], axis=-1)                      # (B, Din+H)
        gates = jnp.dot(xh, w, preferred_element_type=jnp.float32) + b
        i = _sigmoid(gates[:, 0 * H:1 * H])
        f = _sigmoid(gates[:, 1 * H:2 * H])
        g = jnp.tanh(gates[:, 2 * H:3 * H])
        o = _sigmoid(gates[:, 3 * H:4 * H])
        c_new = f * c + i * g
        h_new = o * jnp.tanh(c_new)
        return h_new, c_new

    def step(i, carry):
        h_f, c_f, h_b, c_b = carry
        tb = T - 1 - i
        h_f, c_f = cell(x_ref[i], h_f, c_f, wf, bf)      # forward  : t = i
        h_b, c_b = cell(x_ref[tb], h_b, c_b, wb, bb)     # backward : t = T-1-i
        hs_f[i] = h_f
        hs_b[tb] = h_b
        return h_f, c_f, h_b, c_b

    z = jnp.zeros((B, H), jnp.float32)
    jax.lax.fori_loop(0, T, step, (z, z, z, z), unroll=True)


def bilstm_seq_kernel(x_ref, wf_ref, bf_ref, wb_ref, bb_ref, o_ref, hs_f, hs_b):
    """One bidirectional LSTM layer -> full (T, B, 2H) hidden sequence."""
    _run_bilstm(x_ref, wf_ref, bf_ref, wb_ref, bb_ref, hs_f, hs_b)
    # concat happens in VMEM; the (T, B, 2H) slab is stored once (lane-dense)
    o_ref[...] = jnp.concatenate([hs_f[...], hs_b[...]], axis=-1)


def bilstm_fc_kernel(x_ref, wf_ref, bf_ref, wb_ref, bb_ref, wfc_ref, bfc_ref,
                     o_ref, hs_f, hs_b):
    """Last bidirectional LSTM layer fused with the last-timestep Linear head."""
    _run_bilstm(x_ref, wf_ref, bf_ref, wb_ref, bb_ref, hs_f, hs_b)
    T = x_ref.shape[0]
    # lstmout[:, -1, :] == [ h_fwd after all T steps | h_bwd after its 1st step ]
    fc_in = jnp.concatenate([hs_f[T - 1], hs_b[T - 1]], axis=-1)     # (B, 2H)
    o_ref[...] = (jnp.dot(fc_in, wfc_ref[...],
                          preferred_element_type=jnp.float32) + bfc_ref[...])


# --------------------------------------------------------------------------
# pallas_call wrappers
# --------------------------------------------------------------------------
def _full_spec(shape):
    zeros = (0,) * len(shape)
    return pl.BlockSpec(shape, lambda i: zeros)


def bilstm_layer(x_seq, w_f, b_f, w_b, b_b):
    """x_seq: (T, B, Din) f32 -> (T, B, 2H) f32."""
    T, B, Din = x_seq.shape
    H = w_f.shape[1] // 4
    return pl.pallas_call(
        bilstm_seq_kernel,
        out_shape=jax.ShapeDtypeStruct((T, B, 2 * H), jnp.float32),
        grid_spec=pltpu.PrefetchScalarGridSpec(
            num_scalar_prefetch=0,
            grid=(1,),  # whole sequence resident in VMEM; time loop in-kernel
            in_specs=[
                _full_spec((T, B, Din)),
                _full_spec((Din + H, 4 * H)), _full_spec((1, 4 * H)),
                _full_spec((Din + H, 4 * H)), _full_spec((1, 4 * H)),
            ],
            out_specs=_full_spec((T, B, 2 * H)),
            scratch_shapes=[
                pltpu.VMEM((T, B, H), jnp.float32),   # fwd hidden sequence
                pltpu.VMEM((T, B, H), jnp.float32),   # bwd hidden sequence
            ],
        ),
        compiler_params=pltpu.CompilerParams(
            dimension_semantics=("arbitrary",)),
    )(x_seq, w_f, b_f, w_b, b_b)


def bilstm_fc_layer(x_seq, w_f, b_f, w_b, b_b, w_fc, b_fc):
    """Last layer + Linear head: x_seq (T, B, Din) -> logits (B, C)."""
    T, B, Din = x_seq.shape
    H = w_f.shape[1] // 4
    C = w_fc.shape[1]
    return pl.pallas_call(
        bilstm_fc_kernel,
        out_shape=jax.ShapeDtypeStruct((B, C), jnp.float32),
        grid_spec=pltpu.PrefetchScalarGridSpec(
            num_scalar_prefetch=0,
            grid=(1,),
            in_specs=[
                _full_spec((T, B, Din)),
                _full_spec((Din + H, 4 * H)), _full_spec((1, 4 * H)),
                _full_spec((Din + H, 4 * H)), _full_spec((1, 4 * H)),
                _full_spec((2 * H, C)), _full_spec((1, C)),
            ],
            out_specs=_full_spec((B, C)),
            scratch_shapes=[
                pltpu.VMEM((T, B, H), jnp.float32),
                pltpu.VMEM((T, B, H), jnp.float32),
            ],
        ),
        compiler_params=pltpu.CompilerParams(
            dimension_semantics=("arbitrary",)),
    )(x_seq, w_f, b_f, w_b, b_b, w_fc, b_fc)


# --------------------------------------------------------------------------
# Parameter prep (hoisted out of the forward path) + full forward
# --------------------------------------------------------------------------
def prepare_pallas_params(params):
    """One-time: transpose / stack PyTorch-layout weights into kernel layout."""
    def stack(w_ih, w_hh, b_ih, b_hh):
        w = jnp.concatenate([w_ih, w_hh], axis=1).T.astype(jnp.float32)  # (Din+H,4H)
        b = (b_ih + b_hh).reshape(1, -1).astype(jnp.float32)             # (1,4H)
        return w, b

    out = {"embedding": jnp.asarray(params["embedding"], jnp.float32), "lstm": []}
    for p in params["lstm"]:
        w_f, b_f = stack(p["w_ih_f"], p["w_hh_f"], p["b_ih_f"], p["b_hh_f"])
        w_b, b_b = stack(p["w_ih_b"], p["w_hh_b"], p["b_ih_b"], p["b_hh_b"])
        out["lstm"].append({"w_f": w_f, "b_f": b_f, "w_b": w_b, "b_b": b_b})
    out["fc_w_t"] = jnp.asarray(params["fc_w"].T, jnp.float32)           # (2H, C)
    out["fc_b_row"] = params["fc_b"].reshape(1, -1).astype(jnp.float32)  # (1, C)
    return out


def text_rnn_forward(token_ids, pparams):
    """token_ids: (B, T) int32 -> logits (B, num_classes)."""
    lstm_layers = pparams["lstm"]
    # Embedding gather (plain JAX glue): (B, T, E) -> time-major (T, B, E)
    embed = jnp.take(pparams["embedding"], token_ids, axis=0)
    x = jnp.transpose(embed, (1, 0, 2)).astype(jnp.float32)

    # pad batch to a multiple of 8 sublanes (rows are independent -> no-op)
    B = x.shape[1]
    Bp = -(-B // 8) * 8
    if Bp != B:
        x = jnp.pad(x, ((0, 0), (0, Bp - B), (0, 0)))

    for layer in range(len(lstm_layers) - 1):
        p = lstm_layers[layer]
        x = bilstm_layer(x, p["w_f"], p["b_f"], p["w_b"], p["b_b"])
        # TODO(synk): inter-layer dropout (config.dropout) omitted — inference
        # semantics / dropout=0.0 assumed.

    p = lstm_layers[-1]
    logits = bilstm_fc_layer(x, p["w_f"], p["b_f"], p["w_b"], p["b_b"],
                             pparams["fc_w_t"], pparams["fc_b_row"])
    return logits[:B]


# --------------------------------------------------------------------------
# Pure-JAX reference (PyTorch nn.LSTM semantics) for correctness check
# --------------------------------------------------------------------------
def lstm_direction_ref(x_seq, w_ih, w_hh, b_ih, b_hh):
    T, B, _ = x_seq.shape
    H = w_ih.shape[0] // 4

    def step(carry, xt):
        h, c = carry
        gates = xt @ w_ih.T + h @ w_hh.T + b_ih + b_hh
        i, f, g, o = jnp.split(gates, 4, axis=-1)
        i, f, o = jax.nn.sigmoid(i), jax.nn.sigmoid(f), jax.nn.sigmoid(o)
        g = jnp.tanh(g)
        c = f * c + i * g
        h = o * jnp.tanh(c)
        return (h, c), h

    init = (jnp.zeros((B, H), jnp.float32), jnp.zeros((B, H), jnp.float32))
    _, hs = jax.lax.scan(step, init, x_seq)
    return hs


def text_rnn_ref(token_ids, params):
    embed = jnp.take(params["embedding"], token_ids, axis=0)
    x = jnp.transpose(embed, (1, 0, 2))
    for p in params["lstm"]:
        h_f = lstm_direction_ref(x, p["w_ih_f"], p["w_hh_f"], p["b_ih_f"], p["b_hh_f"])
        h_b = lstm_direction_ref(x[::-1], p["w_ih_b"], p["w_hh_b"],
                                 p["b_ih_b"], p["b_hh_b"])[::-1]
        x = jnp.concatenate([h_f, h_b], axis=-1)
    return x[-1] @ params["fc_w"].T + params["fc_b"]


# --------------------------------------------------------------------------
# Deterministic parameter construction + driver
# --------------------------------------------------------------------------
def init_params(key, vocab_size, embed_dim, hidden, num_layers, num_classes):
    keys = iter(jax.random.split(key, 64))
    u = lambda shape, s: jax.random.uniform(next(keys), shape, jnp.float32, -s, s)
    k = 1.0 / np.sqrt(hidden)

    params = {"embedding": jax.random.normal(next(keys), (vocab_size, embed_dim),
                                             jnp.float32)}
    lstm_layers = []
    for layer in range(num_layers):
        in_dim = embed_dim if layer == 0 else 2 * hidden
        lstm_layers.append({
            "w_ih_f": u((4 * hidden, in_dim), k), "w_hh_f": u((4 * hidden, hidden), k),
            "b_ih_f": u((4 * hidden,), k),        "b_hh_f": u((4 * hidden,), k),
            "w_ih_b": u((4 * hidden, in_dim), k), "w_hh_b": u((4 * hidden, hidden), k),
            "b_ih_b": u((4 * hidden,), k),        "b_hh_b": u((4 * hidden,), k),
        })
    params["lstm"] = lstm_layers
    kf = 1.0 / np.sqrt(2 * hidden)
    params["fc_w"] = u((num_classes, 2 * hidden), kf)
    params["fc_b"] = u((num_classes,), kf)
    return params


if __name__ == "__main__":
    # Small config consistent with the module's __init__
    VOCAB, EMBED, HIDDEN, LAYERS, CLASSES = 32, 16, 32, 2, 4
    B, T = 2, 8

    key = jax.random.PRNGKey(0)
    k_param, k_tok = jax.random.split(key)
    params = init_params(k_param, VOCAB, EMBED, HIDDEN, LAYERS, CLASSES)
    token_ids = jax.random.randint(k_tok, (B, T), 0, VOCAB, dtype=jnp.int32)

    pparams = prepare_pallas_params(params)
    out = jax.block_until_ready(text_rnn_forward(token_ids, pparams))

    ref = jax.block_until_ready(text_rnn_ref(token_ids, params))
    assert out.shape == (B, CLASSES)
    np.testing.assert_allclose(np.asarray(out), np.asarray(ref), atol=1e-3, rtol=1e-3)

    print("KERNEL_OK")
</pallas_src>

<mosaic_0001>
module attributes {stable_mosaic.version = 11 : i64} {
  func.func @bilstm_seq_kernel(%arg0: i32, %arg1: memref<8x8x16xf32, #tpu.memory_space<vmem>>, %arg2: memref<48x128xf32, #tpu.memory_space<vmem>>, %arg3: memref<1x128xf32, #tpu.memory_space<vmem>>, %arg4: memref<48x128xf32, #tpu.memory_space<vmem>>, %arg5: memref<1x128xf32, #tpu.memory_space<vmem>>, %arg6: memref<8x8x64xf32, #tpu.memory_space<vmem>>, %arg7: memref<8x8x32xf32, #tpu.memory_space<vmem>>, %arg8: memref<8x8x32xf32, #tpu.memory_space<vmem>>) attributes {dimension_semantics = [#tpu.dimension_semantics<arbitrary>], iteration_bounds = array<i64: 1>, scalar_prefetch = 0 : i64, scratch_operands = 2 : i64, tpu.core_type = #tpu.core_type<tc>, window_params = [{pipeline_mode = #tpu.pipeline_mode<synchronous>, transform_indices = @transform_0, window_bounds = array<i64: 8, 8, 16>}, {pipeline_mode = #tpu.pipeline_mode<synchronous>, transform_indices = @transform_1, window_bounds = array<i64: 48, 128>}, {pipeline_mode = #tpu.pipeline_mode<synchronous>, transform_indices = @transform_2, window_bounds = array<i64: 1, 128>}, {pipeline_mode = #tpu.pipeline_mode<synchronous>, transform_indices = @transform_3, window_bounds = array<i64: 48, 128>}, {pipeline_mode = #tpu.pipeline_mode<synchronous>, transform_indices = @transform_4, window_bounds = array<i64: 1, 128>}, {pipeline_mode = #tpu.pipeline_mode<synchronous>, transform_indices = @transform_5, window_bounds = array<i64: 8, 8, 64>}]} {
    %c0 = arith.constant 0 : index
    %c0_0 = arith.constant 0 : index
    %0 = vector.load %arg2[%c0, %c0_0] : memref<48x128xf32, #tpu.memory_space<vmem>>, vector<48x128xf32>
    %c0_1 = arith.constant 0 : index
    %c0_2 = arith.constant 0 : index
    %1 = vector.load %arg4[%c0_1, %c0_2] : memref<48x128xf32, #tpu.memory_space<vmem>>, vector<48x128xf32>
    %c0_3 = arith.constant 0 : index
    %c0_4 = arith.constant 0 : index
    %2 = vector.load %arg3[%c0_3, %c0_4] : memref<1x128xf32, #tpu.memory_space<vmem>>, vector<1x128xf32>
    %c0_5 = arith.constant 0 : index
    %c0_6 = arith.constant 0 : index
    %3 = vector.load %arg5[%c0_5, %c0_6] : memref<1x128xf32, #tpu.memory_space<vmem>>, vector<1x128xf32>
    %cst = arith.constant 0.000000e+00 : f32
    %4 = vector.broadcast %cst : f32 to vector<8x32xf32>
    %c0_i32 = arith.constant 0 : i32
    %c7_i32 = arith.constant 7 : i32
    %5 = arith.subi %c7_i32, %c0_i32 : i32
    %6 = arith.index_cast %c0_i32 : i32 to index
    %c0_7 = arith.constant 0 : index
    %c0_8 = arith.constant 0 : index
    %7 = vector.load %arg1[%6, %c0_7, %c0_8] : memref<8x8x16xf32, #tpu.memory_space<vmem>>, vector<1x8x16xf32>
    %8 = vector.shape_cast %7 : vector<1x8x16xf32> to vector<8x16xf32>
    %9 = tpu.concatenate %8, %4 in 1 : vector<8x16xf32>, vector<8x32xf32> -> vector<8x48xf32>
    %cst_9 = arith.constant dense<0.000000e+00> : vector<8x128xf32>
    %10 = tpu.matmul %9, %0, %cst_9 {dimension_numbers = #tpu.dot_dimension_numbers<[1], [0], [0], [1], [0, 0, 1, 1], [], []>} : vector<8x48xf32>, vector<48x128xf32>, vector<8x128xf32> -> vector<8x128xf32>
    %11 = vector.broadcast %2 : vector<1x128xf32> to vector<8x128xf32>
    %12 = arith.addf %10, %11 : vector<8x128xf32>
    %13 = vector.extract_strided_slice %12 {offsets = [0, 0], sizes = [8, 32], strides = [1, 1]} : vector<8x128xf32> to vector<8x32xf32>
    %cst_10 = arith.constant 5.000000e-01 : f32
    %14 = vector.broadcast %cst_10 : f32 to vector<8x32xf32>
    %15 = arith.mulf %14, %13 : vector<8x32xf32>
    %16 = math.tanh %15 : vector<8x32xf32>
    %cst_11 = arith.constant 5.000000e-01 : f32
    %17 = vector.broadcast %cst_11 : f32 to vector<8x32xf32>
    %18 = arith.mulf %17, %16 : vector<8x32xf32>
    %cst_12 = arith.constant 5.000000e-01 : f32
    %19 = vector.broadcast %cst_12 : f32 to vector<8x32xf32>
    %20 = arith.addf %18, %19 : vector<8x32xf32>
    %21 = vector.extract_strided_slice %12 {offsets = [0, 32], sizes = [8, 32], strides = [1, 1]} : vector<8x128xf32> to vector<8x32xf32>
    %cst_13 = arith.constant 5.000000e-01 : f32
    %22 = vector.broadcast %cst_13 : f32 to vector<8x32xf32>
    %23 = arith.mulf %22, %21 : vector<8x32xf32>
    %24 = math.tanh %23 : vector<8x32xf32>
    %cst_14 = arith.constant 5.000000e-01 : f32
    %25 = vector.broadcast %cst_14 : f32 to vector<8x32xf32>
    %26 = arith.mulf %25, %24 : vector<8x32xf32>
    %cst_15 = arith.constant 5.000000e-01 : f32
    %27 = vector.broadcast %cst_15 : f32 to vector<8x32xf32>
    %28 = arith.addf %26, %27 : vector<8x32xf32>
    %29 = vector.extract_strided_slice %12 {offsets = [0, 64], sizes = [8, 32], strides = [1, 1]} : vector<8x128xf32> to vector<8x32xf32>
    %30 = math.tanh %29 : vector<8x32xf32>
    %31 = vector.extract_strided_slice %12 {offsets = [0, 96], sizes = [8, 32], strides = [1, 1]} : vector<8x128xf32> to vector<8x32xf32>
    %cst_16 = arith.constant 5.000000e-01 : f32
    %32 = vector.broadcast %cst_16 : f32 to vector<8x32xf32>
    %33 = arith.mulf %32, %31 : vector<8x32xf32>
    %34 = math.tanh %33 : vector<8x32xf32>
    %cst_17 = arith.constant 5.000000e-01 : f32
    %35 = vector.broadcast %cst_17 : f32 to vector<8x32xf32>
    %36 = arith.mulf %35, %34 : vector<8x32xf32>
    %cst_18 = arith.constant 5.000000e-01 : f32
    %37 = vector.broadcast %cst_18 : f32 to vector<8x32xf32>
    %38 = arith.addf %36, %37 : vector<8x32xf32>
    %39 = arith.mulf %28, %4 : vector<8x32xf32>
    %40 = arith.mulf %20, %30 : vector<8x32xf32>
    %41 = arith.addf %39, %40 : vector<8x32xf32>
    %42 = math.tanh %41 : vector<8x32xf32>
    %43 = arith.mulf %38, %42 : vector<8x32xf32>
    %44 = arith.index_cast %5 : i32 to index
    %c0_19 = arith.constant 0 : index
    %c0_20 = arith.constant 0 : index
    %45 = vector.load %arg1[%44, %c0_19, %c0_20] : memref<8x8x16xf32, #tpu.memory_space<vmem>>, vector<1x8x16xf32>
    %46 = vector.shape_cast %45 : vector<1x8x16xf32> to vector<8x16xf32>
    %47 = tpu.concatenate %46, %4 in 1 : vector<8x16xf32>, vector<8x32xf32> -> vector<8x48xf32>
    %cst_21 = arith.constant dense<0.000000e+00> : vector<8x128xf32>
    %48 = tpu.matmul %47, %1, %cst_21 {dimension_numbers = #tpu.dot_dimension_numbers<[1], [0], [0], [1], [0, 0, 1, 1], [], []>} : vector<8x48xf32>, vector<48x128xf32>, vector<8x128xf32> -> vector<8x128xf32>
    %49 = vector.broadcast %3 : vector<1x128xf32> to vector<8x128xf32>
    %50 = arith.addf %48, %49 : vector<8x128xf32>
    %51 = vector.extract_strided_slice %50 {offsets = [0, 0], sizes = [8, 32], strides = [1, 1]} : vector<8x128xf32> to vector<8x32xf32>
    %cst_22 = arith.constant 5.000000e-01 : f32
    %52 = vector.broadcast %cst_22 : f32 to vector<8x32xf32>
    %53 = arith.mulf %52, %51 : vector<8x32xf32>
    %54 = math.tanh %53 : vector<8x32xf32>
    %cst_23 = arith.constant 5.000000e-01 : f32
    %55 = vector.broadcast %cst_23 : f32 to vector<8x32xf32>
    %56 = arith.mulf %55, %54 : vector<8x32xf32>
    %cst_24 = arith.constant 5.000000e-01 : f32
    %57 = vector.broadcast %cst_24 : f32 to vector<8x32xf32>
    %58 = arith.addf %56, %57 : vector<8x32xf32>
    %59 = vector.extract_strided_slice %50 {offsets = [0, 32], sizes = [8, 32], strides = [1, 1]} : vector<8x128xf32> to vector<8x32xf32>
    %cst_25 = arith.constant 5.000000e-01 : f32
    %60 = vector.broadcast %cst_25 : f32 to vector<8x32xf32>
    %61 = arith.mulf %60, %59 : vector<8x32xf32>
    %62 = math.tanh %61 : vector<8x32xf32>
    %cst_26 = arith.constant 5.000000e-01 : f32
    %63 = vector.broadcast %cst_26 : f32 to vector<8x32xf32>
    %64 = arith.mulf %63, %62 : vector<8x32xf32>
    %cst_27 = arith.constant 5.000000e-01 : f32
    %65 = vector.broadcast %cst_27 : f32 to vector<8x32xf32>
    %66 = arith.addf %64, %65 : vector<8x32xf32>
    %67 = vector.extract_strided_slice %50 {offsets = [0, 64], sizes = [8, 32], strides = [1, 1]} : vector<8x128xf32> to vector<8x32xf32>
    %68 = math.tanh %67 : vector<8x32xf32>
    %69 = vector.extract_strided_slice %50 {offsets = [0, 96], sizes = [8, 32], strides = [1, 1]} : vector<8x128xf32> to vector<8x32xf32>
    %cst_28 = arith.constant 5.000000e-01 : f32
    %70 = vector.broadcast %cst_28 : f32 to vector<8x32xf32>
    %71 = arith.mulf %70, %69 : vector<8x32xf32>
    %72 = math.tanh %71 : vector<8x32xf32>
    %cst_29 = arith.constant 5.000000e-01 : f32
    %73 = vector.broadcast %cst_29 : f32 to vector<8x32xf32>
    %74 = arith.mulf %73, %72 : vector<8x32xf32>
    %cst_30 = arith.constant 5.000000e-01 : f32
    %75 = vector.broadcast %cst_30 : f32 to vector<8x32xf32>
    %76 = arith.addf %74, %75 : vector<8x32xf32>
    %77 = arith.mulf %66, %4 : vector<8x32xf32>
    %78 = arith.mulf %58, %68 : vector<8x32xf32>
    %79 = arith.addf %77, %78 : vector<8x32xf32>
    %80 = math.tanh %79 : vector<8x32xf32>
    %81 = arith.mulf %76, %80 : vector<8x32xf32>
    %82 = arith.index_cast %c0_i32 : i32 to index
    %c0_31 = arith.constant 0 : index
    %c0_32 = arith.constant 0 : index
    %83 = vector.load %arg7[%82, %c0_31, %c0_32] : memref<8x8x32xf32, #tpu.memory_space<vmem>>, vector<1x8x32xf32>
    %84 = vector.shape_cast %83 : vector<1x8x32xf32> to vector<8x32xf32>
    %85 = vector.shape_cast %43 : vector<8x32xf32> to vector<1x8x32xf32>
    tpu.vector_store %arg7[%82, %c0_31, %c0_32], %85 {strides = array<i32>} : memref<8x8x32xf32, #tpu.memory_space<vmem>>, vector<1x8x32xf32>,
    %86 = arith.index_cast %5 : i32 to index
    %c0_33 = arith.constant 0 : index
    %c0_34 = arith.constant 0 : index
    %87 = vector.load %arg8[%86, %c0_33, %c0_34] : memref<8x8x32xf32, #tpu.memory_space<vmem>>, vector<1x8x32xf32>
    %88 = vector.shape_cast %87 : vector<1x8x32xf32> to vector<8x32xf32>
    %89 = vector.shape_cast %81 : vector<8x32xf32> to vector<1x8x32xf32>
    tpu.vector_store %arg8[%86, %c0_33, %c0_34], %89 {strides = array<i32>} : memref<8x8x32xf32, #tpu.memory_space<vmem>>, vector<1x8x32xf32>,
    %c1_i32 = arith.constant 1 : i32
    %c7_i32_35 = arith.constant 7 : i32
    %90 = arith.subi %c7_i32_35, %c1_i32 : i32
    %91 = arith.index_cast %c1_i32 : i32 to index
    %c0_36 = arith.constant 0 : index
    %c0_37 = arith.constant 0 : index
    %92 = vector.load %arg1[%91, %c0_36, %c0_37] : memref<8x8x16xf32, #tpu.memory_space<vmem>>, vector<1x8x16xf32>
    %93 = vector.shape_cast %92 : vector<1x8x16xf32> to vector<8x16xf32>
    %94 = tpu.concatenate %93, %43 in 1 : vector<8x16xf32>, vector<8x32xf32> -> vector<8x48xf32>
    %cst_38 = arith.constant dense<0.000000e+00> : vector<8x128xf32>
    %95 = tpu.matmul %94, %0, %cst_38 {dimension_numbers = #tpu.dot_dimension_numbers<[1], [0], [0], [1], [0, 0, 1, 1], [], []>} : vector<8x48xf32>, vector<48x128xf32>, vector<8x128xf32> -> vector<8x128xf32>
    %96 = vector.broadcast %2 : vector<1x128xf32> to vector<8x128xf32>
    %97 = arith.addf %95, %96 : vector<8x128xf32>
    %98 = vector.extract_strided_slice %97 {offsets = [0, 0], sizes = [8, 32], strides = [1, 1]} : vector<8x128xf32> to vector<8x32xf32>
    %cst_39 = arith.constant 5.000000e-01 : f32
    %99 = vector.broadcast %cst_39 : f32 to vector<8x32xf32>
    %100 = arith.mulf %99, %98 : vector<8x32xf32>
    %101 = math.tanh %100 : vector<8x32xf32>
    %cst_40 = arith.constant 5.000000e-01 : f32
    %102 = vector.broadcast %cst_40 : f32 to vector<8x32xf32>
    %103 = arith.mulf %102, %101 : vector<8x32xf32>
    %cst_41 = arith.constant 5.000000e-01 : f32
    %104 = vector.broadcast %cst_41 : f32 to vector<8x32xf32>
    %105 = arith.addf %103, %104 : vector<8x32xf32>
    %106 = vector.extract_strided_slice %97 {offsets = [0, 32], sizes = [8, 32], strides = [1, 1]} : vector<8x128xf32> to vector<8x32xf32>
    %cst_42 = arith.constant 5.000000e-01 : f32
    %107 = vector.broadcast %cst_42 : f32 to vector<8x32xf32>
    %108 = arith.mulf %107, %106 : vector<8x32xf32>
    %109 = math.tanh %108 : vector<8x32xf32>
    %cst_43 = arith.constant 5.000000e-01 : f32
    %110 = vector.broadcast %cst_43 : f32 to vector<8x32xf32>
    %111 = arith.mulf %110, %109 : vector<8x32xf32>
    %cst_44 = arith.constant 5.000000e-01 : f32
    %112 = vector.broadcast %cst_44 : f32 to vector<8x32xf32>
    %113 = arith.addf %111, %112 : vector<8x32xf32>
    %114 = vector.extract_strided_slice %97 {offsets = [0, 64], sizes = [8, 32], strides = [1, 1]} : vector<8x128xf32> to vector<8x32xf32>
    %115 = math.tanh %114 : vector<8x32xf32>
    %116 = vector.extract_strided_slice %97 {offsets = [0, 96], sizes = [8, 32], strides = [1, 1]} : vector<8x128xf32> to vector<8x32xf32>
    %cst_45 = arith.constant 5.000000e-01 : f32
    %117 = vector.broadcast %cst_45 : f32 to vector<8x32xf32>
    %118 = arith.mulf %117, %116 : vector<8x32xf32>
    %119 = math.tanh %118 : vector<8x32xf32>
    %cst_46 = arith.constant 5.000000e-01 : f32
    %120 = vector.broadcast %cst_46 : f32 to vector<8x32xf32>
    %121 = arith.mulf %120, %119 : vector<8x32xf32>
    %cst_47 = arith.constant 5.000000e-01 : f32
    %122 = vector.broadcast %cst_47 : f32 to vector<8x32xf32>
    %123 = arith.addf %121, %122 : vector<8x32xf32>
    %124 = arith.mulf %113, %41 : vector<8x32xf32>
    %125 = arith.mulf %105, %115 : vector<8x32xf32>
    %126 = arith.addf %124, %125 : vector<8x32xf32>
    %127 = math.tanh %126 : vector<8x32xf32>
    %128 = arith.mulf %123, %127 : vector<8x32xf32>
    %129 = arith.index_cast %90 : i32 to index
    %c0_48 = arith.constant 0 : index
    %c0_49 = arith.constant 0 : index
    %130 = vector.load %arg1[%129, %c0_48, %c0_49] : memref<8x8x16xf32, #tpu.memory_space<vmem>>, vector<1x8x16xf32>
    %131 = vector.shape_cast %130 : vector<1x8x16xf32> to vector<8x16xf32>
    %132 = tpu.concatenate %131, %81 in 1 : vector<8x16xf32>, vector<8x32xf32> -> vector<8x48xf32>
    %cst_50 = arith.constant dense<0.000000e+00> : vector<8x128xf32>
    %133 = tpu.matmul %132, %1, %cst_50 {dimension_numbers = #tpu.dot_dimension_numbers<[1], [0], [0], [1], [0, 0, 1, 1], [], []>} : vector<8x48xf32>, vector<48x128xf32>, vector<8x128xf32> -> vector<8x128xf32>
    %134 = vector.broadcast %3 : vector<1x128xf32> to vector<8x128xf32>
    %135 = arith.addf %133, %134 : vector<8x128xf32>
    %136 = vector.extract_strided_slice %135 {offsets = [0, 0], sizes = [8, 32], strides = [1, 1]} : vector<8x128xf32> to vector<8x32xf32>
    %cst_51 = arith.constant 5.000000e-01 : f32
    %137 = vector.broadcast %cst_51 : f32 to vector<8x32xf32>
    %138 = arith.mulf %137, %136 : vector<8x32xf32>
    %139 = math.tanh %138 : vector<8x32xf32>
    %cst_52 = arith.constant 5.000000e-01 : f32
    %140 = vector.broadcast %cst_52 : f32 to vector<8x32xf32>
    %141 = arith.mulf %140, %139 : vector<8x32xf32>
    %cst_53 = arith.constant 5.000000e-01 : f32
    %142 = vector.broadcast %cst_53 : f32 to vector<8x32xf32>
    %143 = arith.addf %141, %142 : vector<8x32xf32>
    %144 = vector.extract_strided_slice %135 {offsets = [0, 32], sizes = [8, 32], strides = [1, 1]} : vector<8x128xf32> to vector<8x32xf32>
    %cst_54 = arith.constant 5.000000e-01 : f32
    %145 = vector.broadcast %cst_54 : f32 to vector<8x32xf32>
    %146 = arith.mulf %145, %144 : vector<8x32xf32>
    %147 = math.tanh %146 : vector<8x32xf32>
    %cst_55 = arith.constant 5.000000e-01 : f32
    %148 = vector.broadcast %cst_55 : f32 to vector<8x32xf32>
    %149 = arith.mulf %148, %147 : vector<8x32xf32>
    %cst_56 = arith.constant 5.000000e-01 : f32
    %150 = vector.broadcast %cst_56 : f32 to vector<8x32xf32>
    %151 = arith.addf %149, %150 : vector<8x32xf32>
    %152 = vector.extract_strided_slice %135 {offsets = [0, 64], sizes = [8, 32], strides = [1, 1]} : vector<8x128xf32> to vector<8x32xf32>
    %153 = math.tanh %152 : vector<8x32xf32>
    %154 = vector.extract_strided_slice %135 {offsets = [0, 96], sizes = [8, 32], strides = [1, 1]} : vector<8x128xf32> to vector<8x32xf32>
    %cst_57 = arith.constant 5.000000e-01 : f32
    %155 = vector.broadcast %cst_57 : f32 to vector<8x32xf32>
    %156 = arith.mulf %155, %154 : vector<8x32xf32>
    %157 = math.tanh %156 : vector<8x32xf32>
    %cst_58 = arith.constant 5.000000e-01 : f32
    %158 = vector.broadcast %cst_58 : f32 to vector<8x32xf32>
    %159 = arith.mulf %158, %157 : vector<8x32xf32>
    %cst_59 = arith.constant 5.000000e-01 : f32
    %160 = vector.broadcast %cst_59 : f32 to vector<8x32xf32>
    %161 = arith.addf %159, %160 : vector<8x32xf32>
    %162 = arith.mulf %151, %79 : vector<8x32xf32>
    %163 = arith.mulf %143, %153 : vector<8x32xf32>
    %164 = arith.addf %162, %163 : vector<8x32xf32>
    %165 = math.tanh %164 : vector<8x32xf32>
    %166 = arith.mulf %161, %165 : vector<8x32xf32>
    %167 = arith.index_cast %c1_i32 : i32 to index
    %c0_60 = arith.constant 0 : index
    %c0_61 = arith.constant 0 : index
    %168 = vector.load %arg7[%167, %c0_60, %c0_61] : memref<8x8x32xf32, #tpu.memory_space<vmem>>, vector<1x8x32xf32>
    %169 = vector.shape_cast %168 : vector<1x8x32xf32> to vector<8x32xf32>
    %170 = vector.shape_cast %128 : vector<8x32xf32> to vector<1x8x32xf32>
    tpu.vector_store %arg7[%167, %c0_60, %c0_61], %170 {strides = array<i32>} : memref<8x8x32xf32, #tpu.memory_space<vmem>>, vector<1x8x32xf32>,
    %171 = arith.index_cast %90 : i32 to index
    %c0_62 = arith.constant 0 : index
    %c0_63 = arith.constant 0 : index
    %172 = vector.load %arg8[%171, %c0_62, %c0_63] : memref<8x8x32xf32, #tpu.memory_space<vmem>>, vector<1x8x32xf32>
    %173 = vector.shape_cast %172 : vector<1x8x32xf32> to vector<8x32xf32>
    %174 = vector.shape_cast %166 : vector<8x32xf32> to vector<1x8x32xf32>
    tpu.vector_store %arg8[%171, %c0_62, %c0_63], %174 {strides = array<i32>} : memref<8x8x32xf32, #tpu.memory_space<vmem>>, vector<1x8x32xf32>,
    %c2_i32 = arith.constant 2 : i32
    %c7_i32_64 = arith.constant 7 : i32
    %175 = arith.subi %c7_i32_64, %c2_i32 : i32
    %176 = arith.index_cast %c2_i32 : i32 to index
    %c0_65 = arith.constant 0 : index
    %c0_66 = arith.constant 0 : index
    %177 = vector.load %arg1[%176, %c0_65, %c0_66] : memref<8x8x16xf32, #tpu.memory_space<vmem>>, vector<1x8x16xf32>
    %178 = vector.shape_cast %177 : vector<1x8x16xf32> to vector<8x16xf32>
    %179 = tpu.concatenate %178, %128 in 1 : vector<8x16xf32>, vector<8x32xf32> -> vector<8x48xf32>
    %cst_67 = arith.constant dense<0.000000e+00> : vector<8x128xf32>
    %180 = tpu.matmul %179, %0, %cst_67 {dimension_numbers = #tpu.dot_dimension_numbers<[1], [0], [0], [1], [0, 0, 1, 1], [], []>} : vector<8x48xf32>, vector<48x128xf32>, vector<8x128xf32> -> vector<8x128xf32>
    %181 = vector.broadcast %2 : vector<1x128xf32> to vector<8x128xf32>
    %182 = arith.addf %180, %181 : vector<8x128xf32>
    %183 = vector.extract_strided_slice %182 {offsets = [0, 0], sizes = [8, 32], strides = [1, 1]} : vector<8x128xf32> to vector<8x32xf32>
    %cst_68 = arith.constant 5.000000e-01 : f32
    %184 = vector.broadcast %cst_68 : f32 to vector<8x32xf32>
    %185 = arith.mulf %184, %183 : vector<8x32xf32>
    %186 = math.tanh %185 : vector<8x32xf32>
    %cst_69 = arith.constant 5.000000e-01 : f32
    %187 = vector.broadcast %cst_69 : f32 to vector<8x32xf32>
    %188 = arith.mulf %187, %186 : vector<8x32xf32>
    %cst_70 = arith.constant 5.000000e-01 : f32
    %189 = vector.broadcast %cst_70 : f32 to vector<8x32xf32>
    %190 = arith.addf %188, %189 : vector<8x32xf32>
    %191 = vector.extract_strided_slice %182 {offsets = [0, 32], sizes = [8, 32], strides = [1, 1]} : vector<8x128xf32> to vector<8x32xf32>
    %cst_71 = arith.constant 5.000000e-01 : f32
    %192 = vector.broadcast %cst_71 : f32 to vector<8x32xf32>
    %193 = arith.mulf %192, %191 : vector<8x32xf32>
    %194 = math.tanh %193 : vector<8x32xf32>
    %cst_72 = arith.constant 5.000000e-01 : f32
    %195 = vector.broadcast %cst_72 : f32 to vector<8x32xf32>
    %196 = arith.mulf %195, %194 : vector<8x32xf32>
    %cst_73 = arith.constant 5.000000e-01 : f32
    %197 = vector.broadcast %cst_73 : f32 to vector<8x32xf32>
    %198 = arith.addf %196, %197 : vector<8x32xf32>
    %199 = vector.extract_strided_slice %182 {offsets = [0, 64], sizes = [8, 32], strides = [1, 1]} : vector<8x128xf32> to vector<8x32xf32>
    %200 = math.tanh %199 : vector<8x32xf32>
    %201 = vector.extract_strided_slice %182 {offsets = [0, 96], sizes = [8, 32], strides = [1, 1]} : vector<8x128xf32> to vector<8x32xf32>
    %cst_74 = arith.constant 5.000000e-01 : f32
    %202 = vector.broadcast %cst_74 : f32 to vector<8x32xf32>
    %203 = arith.mulf %202, %201 : vector<8x32xf32>
    %204 = math.tanh %203 : vector<8x32xf32>
    %cst_75 = arith.constant 5.000000e-01 : f32
    %205 = vector.broadcast %cst_75 : f32 to vector<8x32xf32>
    %206 = arith.mulf %205, %204 : vector<8x32xf32>
    %cst_76 = arith.constant 5.000000e-01 : f32
    %207 = vector.broadcast %cst_76 : f32 to vector<8x32xf32>
    %208 = arith.addf %206, %207 : vector<8x32xf32>
    %209 = arith.mulf %198, %126 : vector<8x32xf32>
    %210 = arith.mulf %190, %200 : vector<8x32xf32>
    %211 = arith.addf %209, %210 : vector<8x32xf32>
    %212 = math.tanh %211 : vector<8x32xf32>
    %213 = arith.mulf %208, %212 : vector<8x32xf32>
    %214 = arith.index_cast %175 : i32 to index
    %c0_77 = arith.constant 0 : index
    %c0_78 = arith.constant 0 : index
    %215 = vector.load %arg1[%214, %c0_77, %c0_78] : memref<8x8x16xf32, #tpu.memory_space<vmem>>, vector<1x8x16xf32>
    %216 = vector.shape_cast %215 : vector<1x8x16xf32> to vector<8x16xf32>
    %217 = tpu.concatenate %216, %166 in 1 : vector<8x16xf32>, vector<8x32xf32> -> vector<8x48xf32>
    %cst_79 = arith.constant dense<0.000000e+00> : vector<8x128xf32>
    %218 = tpu.matmul %217, %1, %cst_79 {dimension_numbers = #tpu.dot_dimension_numbers<[1], [0], [0], [1], [0, 0, 1, 1], [], []>} : vector<8x48xf32>, vector<48x128xf32>, vector<8x128xf32> -> vector<8x128xf32>
    %219 = vector.broadcast %3 : vector<1x128xf32> to vector<8x128xf32>
    %220 = arith.addf %218, %219 : vector<8x128xf32>
    %221 = vector.extract_strided_slice %220 {offsets = [0, 0], sizes = [8, 32], strides = [1, 1]} : vector<8x128xf32> to vector<8x32xf32>
    %cst_80 = arith.constant 5.000000e-01 : f32
    %222 = vector.broadcast %cst_80 : f32 to vector<8x32xf32>
    %223 = arith.mulf %222, %221 : vector<8x32xf32>
    %224 = math.tanh %223 : vector<8x32xf32>
    %cst_81 = arith.constant 5.000000e-01 : f32
    %225 = vector.broadcast %cst_81 : f32 to vector<8x32xf32>
    %226 = arith.mulf %225, %224 : vector<8x32xf32>
    %cst_82 = arith.constant 5.000000e-01 : f32
    %227 = vector.broadcast %cst_82 : f32 to vector<8x32xf32>
    %228 = arith.addf %226, %227 : vector<8x32xf32>
    %229 = vector.extract_strided_slice %220 {offsets = [0, 32], sizes = [8, 32], strides = [1, 1]} : vector<8x128xf32> to vector<8x32xf32>
    %cst_83 = arith.constant 5.000000e-01 : f32
    %230 = vector.broadcast %cst_83 : f32 to vector<8x32xf32>
    %231 = arith.mulf %230, %229 : vector<8x32xf32>
    %232 = math.tanh %231 : vector<8x32xf32>
    %cst_84 = arith.constant 5.000000e-01 : f32
    %233 = vector.broadcast %cst_84 : f32 to vector<8x32xf32>
    %234 = arith.mulf %233, %232 : vector<8x32xf32>
    %cst_85 = arith.constant 5.000000e-01 : f32
    %235 = vector.broadcast %cst_85 : f32 to vector<8x32xf32>
    %236 = arith.addf %234, %235 : vector<8x32xf32>
    %237 = vector.extract_strided_slice %220 {offsets = [0, 64], sizes = [8, 32], strides = [1, 1]} : vector<8x128xf32> to vector<8x32xf32>
    %238 = math.tanh %237 : vector<8x32xf32>
    %239 = vector.extract_strided_slice %220 {offsets = [0, 96], sizes = [8, 32], strides = [1, 1]} : vector<8x128xf32> to vector<8x32xf32>
    %cst_86 = arith.constant 5.000000e-01 : f32
    %240 = vector.broadcast %cst_86 : f32 to vector<8x32xf32>
    %241 = arith.mulf %240, %239 : vector<8x32xf32>
    %242 = math.tanh %241 : vector<8x32xf32>
    %cst_87 = arith.constant 5.000000e-01 : f32
    %243 = vector.broadcast %cst_87 : f32 to vector<8x32xf32>
    %244 = arith.mulf %243, %242 : vector<8x32xf32>
    %cst_88 = arith.constant 5.000000e-01 : f32
    %245 = vector.broadcast %cst_88 : f32 to vector<8x32xf32>
    %246 = arith.addf %244, %245 : vector<8x32xf32>
    %247 = arith.mulf %236, %164 : vector<8x32xf32>
    %248 = arith.mulf %228, %238 : vector<8x32xf32>
    %249 = arith.addf %247, %248 : vector<8x32xf32>
    %250 = math.tanh %249 : vector<8x32xf32>
    %251 = arith.mulf %246, %250 : vector<8x32xf32>
    %252 = arith.index_cast %c2_i32 : i32 to index
    %c0_89 = arith.constant 0 : index
    %c0_90 = arith.constant 0 : index
    %253 = vector.load %arg7[%252, %c0_89, %c0_90] : memref<8x8x32xf32, #tpu.memory_space<vmem>>, vector<1x8x32xf32>
    %254 = vector.shape_cast %253 : vector<1x8x32xf32> to vector<8x32xf32>
    %255 = vector.shape_cast %213 : vector<8x32xf32> to vector<1x8x32xf32>
    tpu.vector_store %arg7[%252, %c0_89, %c0_90], %255 {strides = array<i32>} : memref<8x8x32xf32, #tpu.memory_space<vmem>>, vector<1x8x32xf32>,
    %256 = arith.index_cast %175 : i32 to index
    %c0_91 = arith.constant 0 : index
    %c0_92 = arith.constant 0 : index
    %257 = vector.load %arg8[%256, %c0_91, %c0_92] : memref<8x8x32xf32, #tpu.memory_space<vmem>>, vector<1x8x32xf32>
    %258 = vector.shape_cast %257 : vector<1x8x32xf32> to vector<8x32xf32>
    %259 = vector.shape_cast %251 : vector<8x32xf32> to vector<1x8x32xf32>
    tpu.vector_store %arg8[%256, %c0_91, %c0_92], %259 {strides = array<i32>} : memref<8x8x32xf32, #tpu.memory_space<vmem>>, vector<1x8x32xf32>,
    %c3_i32 = arith.constant 3 : i32
    %c7_i32_93 = arith.constant 7 : i32
    %260 = arith.subi %c7_i32_93, %c3_i32 : i32
    %261 = arith.index_cast %c3_i32 : i32 to index
    %c0_94 = arith.constant 0 : index
    %c0_95 = arith.constant 0 : index
    %262 = vector.load %arg1[%261, %c0_94, %c0_95] : memref<8x8x16xf32, #tpu.memory_space<vmem>>, vector<1x8x16xf32>
    %263 = vector.shape_cast %262 : vector<1x8x16xf32> to vector<8x16xf32>
    %264 = tpu.concatenate %263, %213 in 1 : vector<8x16xf32>, vector<8x32xf32> -> vector<8x48xf32>
    %cst_96 = arith.constant dense<0.000000e+00> : vector<8x128xf32>
    %265 = tpu.matmul %264, %0, %cst_96 {dimension_numbers = #tpu.dot_dimension_numbers<[1], [0], [0], [1], [0, 0, 1, 1], [], []>} : vector<8x48xf32>, vector<48x128xf32>, vector<8x128xf32> -> vector<8x128xf32>
    %266 = vector.broadcast %2 : vector<1x128xf32> to vector<8x128xf32>
    %267 = arith.addf %265, %266 : vector<8x128xf32>
    %268 = vector.extract_strided_slice %267 {offsets = [0, 0], sizes = [8, 32], strides = [1, 1]} : vector<8x128xf32> to vector<8x32xf32>
    %cst_97 = arith.constant 5.000000e-01 : f32
    %269 = vector.broadcast %cst_97 : f32 to vector<8x32xf32>
    %270 = arith.mulf %269, %268 : vector<8x32xf32>
    %271 = math.tanh %270 : vector<8x32xf32>
    %cst_98 = arith.constant 5.000000e-01 : f32
    %272 = vector.broadcast %cst_98 : f32 to vector<8x32xf32>
    %273 = arith.mulf %272, %271 : vector<8x32xf32>
    %cst_99 = arith.constant 5.000000e-01 : f32
    %274 = vector.broadcast %cst_99 : f32 to vector<8x32xf32>
    %275 = arith.addf %273, %274 : vector<8x32xf32>
    %276 = vector.extract_strided_slice %267 {offsets = [0, 32], sizes = [8, 32], strides = [1, 1]} : vector<8x128xf32> to vector<8x32xf32>
    %cst_100 = arith.constant 5.000000e-01 : f32
    %277 = vector.broadcast %cst_100 : f32 to vector<8x32xf32>
    %278 = arith.mulf %277, %276 : vector<8x32xf32>
    %279 = math.tanh %278 : vector<8x32xf32>
    %cst_101 = arith.constant 5.000000e-01 : f32
    %280 = vector.broadcast %cst_101 : f32 to vector<8x32xf32>
    %281 = arith.mulf %280, %279 : vector<8x32xf32>
    %cst_102 = arith.constant 5.000000e-01 : f32
    %282 = vector.broadcast %cst_102 : f32 to vector<8x32xf32>
    %283 = arith.addf %281, %282 : vector<8x32xf32>
    %284 = vector.extract_strided_slice %267 {offsets = [0, 64], sizes = [8, 32], strides = [1, 1]} : vector<8x128xf32> to vector<8x32xf32>
    %285 = math.tanh %284 : vector<8x32xf32>
    %286 = vector.extract_strided_slice %267 {offsets = [0, 96], sizes = [8, 32], strides = [1, 1]} : vector<8x128xf32> to vector<8x32xf32>
    %cst_103 = arith.constant 5.000000e-01 : f32
    %287 = vector.broadcast %cst_103 : f32 to vector<8x32xf32>
    %288 = arith.mulf %287, %286 : vector<8x32xf32>
    %289 = math.tanh %288 : vector<8x32xf32>
    %cst_104 = arith.constant 5.000000e-01 : f32
    %290 = vector.broadcast %cst_104 : f32 to vector<8x32xf32>
    %291 = arith.mulf %290, %289 : vector<8x32xf32>
    %cst_105 = arith.constant 5.000000e-01 : f32
    %292 = vector.broadcast %cst_105 : f32 to vector<8x32xf32>
    %293 = arith.addf %291, %292 : vector<8x32xf32>
    %294 = arith.mulf %283, %211 : vector<8x32xf32>
    %295 = arith.mulf %275, %285 : vector<8x32xf32>
    %296 = arith.addf %294, %295 : vector<8x32xf32>
    %297 = math.tanh %296 : vector<8x32xf32>
    %298 = arith.mulf %293, %297 : vector<8x32xf32>
    %299 = arith.index_cast %260 : i32 to index
    %c0_106 = arith.constant 0 : index
    %c0_107 = arith.constant 0 : index
    %300 = vector.load %arg1[%299, %c0_106, %c0_107] : memref<8x8x16xf32, #tpu.memory_space<vmem>>, vector<1x8x16xf32>
    %301 = vector.shape_cast %300 : vector<1x8x16xf32> to vector<8x16xf32>
    %302 = tpu.concatenate %301, %251 in 1 : vector<8x16xf32>, vector<8x32xf32> -> vector<8x48xf32>
    %cst_108 = arith.constant dense<0.000000e+00> : vector<8x128xf32>
    %303 = tpu.matmul %302, %1, %cst_108 {dimension_numbers = #tpu.dot_dimension_numbers<[1], [0], [0], [1], [0, 0, 1, 1], [], []>} : vector<8x48xf32>, vector<48x128xf32>, vector<8x128xf32> -> vector<8x128xf32>
    %304 = vector.broadcast %3 : vector<1x128xf32> to vector<8x128xf32>
    %305 = arith.addf %303, %304 : vector<8x128xf32>
    %306 = vector.extract_strided_slice %305 {offsets = [0, 0], sizes = [8, 32], strides = [1, 1]} : vector<8x128xf32> to vector<8x32xf32>
    %cst_109 = arith.constant 5.000000e-01 : f32
    %307 = vector.broadcast %cst_109 : f32 to vector<8x32xf32>
    %308 = arith.mulf %307, %306 : vector<8x32xf32>
    %309 = math.tanh %308 : vector<8x32xf32>
    %cst_110 = arith.constant 5.000000e-01 : f32
    %310 = vector.broadcast %cst_110 : f32 to vector<8x32xf32>
    %311 = arith.mulf %310, %309 : vector<8x32xf32>
    %cst_111 = arith.constant 5.000000e-01 : f32
    %312 = vector.broadcast %cst_111 : f32 to vector<8x32xf32>
    %313 = arith.addf %311, %312 : vector<8x32xf32>
    %314 = vector.extract_strided_slice %305 {offsets = [0, 32], sizes = [8, 32], strides = [1, 1]} : vector<8x128xf32> to vector<8x32xf32>
    %cst_112 = arith.constant 5.000000e-01 : f32
    %315 = vector.broadcast %cst_112 : f32 to vector<8x32xf32>
    %316 = arith.mulf %315, %314 : vector<8x32xf32>
    %317 = math.tanh %316 : vector<8x32xf32>
    %cst_113 = arith.constant 5.000000e-01 : f32
    %318 = vector.broadcast %cst_113 : f32 to vector<8x32xf32>
    %319 = arith.mulf %318, %317 : vector<8x32xf32>
    %cst_114 = arith.constant 5.000000e-01 : f32
    %320 = vector.broadcast %cst_114 : f32 to vector<8x32xf32>
    %321 = arith.addf %319, %320 : vector<8x32xf32>
    %322 = vector.extract_strided_slice %305 {offsets = [0, 64], sizes = [8, 32], strides = [1, 1]} : vector<8x128xf32> to vector<8x32xf32>
    %323 = math.tanh %322 : vector<8x32xf32>
    %324 = vector.extract_strided_slice %305 {offsets = [0, 96], sizes = [8, 32], strides = [1, 1]} : vector<8x128xf32> to vector<8x32xf32>
    %cst_115 = arith.constant 5.000000e-01 : f32
    %325 = vector.broadcast %cst_115 : f32 to vector<8x32xf32>
    %326 = arith.mulf %325, %324 : vector<8x32xf32>
    %327 = math.tanh %326 : vector<8x32xf32>
    %cst_116 = arith.constant 5.000000e-01 : f32
    %328 = vector.broadcast %cst_116 : f32 to vector<8x32xf32>
    %329 = arith.mulf %328, %327 : vector<8x32xf32>
    %cst_117 = arith.constant 5.000000e-01 : f32
    %330 = vector.broadcast %cst_117 : f32 to vector<8x32xf32>
    %331 = arith.addf %329, %330 : vector<8x32xf32>
    %332 = arith.mulf %321, %249 : vector<8x32xf32>
    %333 = arith.mulf %313, %323 : vector<8x32xf32>
    %334 = arith.addf %332, %333 : vector<8x32xf32>
    %335 = math.tanh %334 : vector<8x32xf32>
    %336 = arith.mulf %331, %335 : vector<8x32xf32>
    %337 = arith.index_cast %c3_i32 : i32 to index
    %c0_118 = arith.constant 0 : index
    %c0_119 = arith.constant 0 : index
    %338 = vector.load %arg7[%337, %c0_118, %c0_119] : memref<8x8x32xf32, #tpu.memory_space<vmem>>, vector<1x8x32xf32>
    %339 = vector.shape_cast %338 : vector<1x8x32xf32> to vector<8x32xf32>
    %340 = vector.shape_cast %298 : vector<8x32xf32> to vector<1x8x32xf32>
    tpu.vector_store %arg7[%337, %c0_118, %c0_119], %340 {strides = array<i32>} : memref<8x8x32xf32, #tpu.memory_space<vmem>>, vector<1x8x32xf32>,
    %341 = arith.index_cast %260 : i32 to index
    %c0_120 = arith.constant 0 : index
    %c0_121 = arith.constant 0 : index
    %342 = vector.load %arg8[%341, %c0_120, %c0_121] : memref<8x8x32xf32, #tpu.memory_space<vmem>>, vector<1x8x32xf32>
    %343 = vector.shape_cast %342 : vector<1x8x32xf32> to vector<8x32xf32>
    %344 = vector.shape_cast %336 : vector<8x32xf32> to vector<1x8x32xf32>
    tpu.vector_store %arg8[%341, %c0_120, %c0_121], %344 {strides = array<i32>} : memref<8x8x32xf32, #tpu.memory_space<vmem>>, vector<1x8x32xf32>,
    %c4_i32 = arith.constant 4 : i32
    %c7_i32_122 = arith.constant 7 : i32
    %345 = arith.subi %c7_i32_122, %c4_i32 : i32
    %346 = arith.index_cast %c4_i32 : i32 to index
    %c0_123 = arith.constant 0 : index
    %c0_124 = arith.constant 0 : index
    %347 = vector.load %arg1[%346, %c0_123, %c0_124] : memref<8x8x16xf32, #tpu.memory_space<vmem>>, vector<1x8x16xf32>
    %348 = vector.shape_cast %347 : vector<1x8x16xf32> to vector<8x16xf32>
    %349 = tpu.concatenate %348, %298 in 1 : vector<8x16xf32>, vector<8x32xf32> -> vector<8x48xf32>
    %cst_125 = arith.constant dense<0.000000e+00> : vector<8x128xf32>
    %350 = tpu.matmul %349, %0, %cst_125 {dimension_numbers = #tpu.dot_dimension_numbers<[1], [0], [0], [1], [0, 0, 1, 1], [], []>} : vector<8x48xf32>, vector<48x128xf32>, vector<8x128xf32> -> vector<8x128xf32>
    %351 = vector.broadcast %2 : vector<1x128xf32> to vector<8x128xf32>
    %352 = arith.addf %350, %351 : vector<8x128xf32>
    %353 = vector.extract_strided_slice %352 {offsets = [0, 0], sizes = [8, 32], strides = [1, 1]} : vector<8x128xf32> to vector<8x32xf32>
    %cst_126 = arith.constant 5.000000e-01 : f32
    %354 = vector.broadcast %cst_126 : f32 to vector<8x32xf32>
    %355 = arith.mulf %354, %353 : vector<8x32xf32>
    %356 = math.tanh %355 : vector<8x32xf32>
    %cst_127 = arith.constant 5.000000e-01 : f32
    %357 = vector.broadcast %cst_127 : f32 to vector<8x32xf32>
    %358 = arith.mulf %357, %356 : vector<8x32xf32>
    %cst_128 = arith.constant 5.000000e-01 : f32
    %359 = vector.broadcast %cst_128 : f32 to vector<8x32xf32>
    %360 = arith.addf %358, %359 : vector<8x32xf32>
    %361 = vector.extract_strided_slice %352 {offsets = [0, 32], sizes = [8, 32], strides = [1, 1]} : vector<8x128xf32> to vector<8x32xf32>
    %cst_129 = arith.constant 5.000000e-01 : f32
    %362 = vector.broadcast %cst_129 : f32 to vector<8x32xf32>
    %363 = arith.mulf %362, %361 : vector<8x32xf32>
    %364 = math.tanh %363 : vector<8x32xf32>
    %cst_130 = arith.constant 5.000000e-01 : f32
    %365 = vector.broadcast %cst_130 : f32 to vector<8x32xf32>
    %366 = arith.mulf %365, %364 : vector<8x32xf32>
    %cst_131 = arith.constant 5.000000e-01 : f32
    %367 = vector.broadcast %cst_131 : f32 to vector<8x32xf32>
    %368 = arith.addf %366, %367 : vector<8x32xf32>
    %369 = vector.extract_strided_slice %352 {offsets = [0, 64], sizes = [8, 32], strides = [1, 1]} : vector<8x128xf32> to vector<8x32xf32>
    %370 = math.tanh %369 : vector<8x32xf32>
    %371 = vector.extract_strided_slice %352 {offsets = [0, 96], sizes = [8, 32], strides = [1, 1]} : vector<8x128xf32> to vector<8x32xf32>
    %cst_132 = arith.constant 5.000000e-01 : f32
    %372 = vector.broadcast %cst_132 : f32 to vector<8x32xf32>
    %373 = arith.mulf %372, %371 : vector<8x32xf32>
    %374 = math.tanh %373 : vector<8x32xf32>
    %cst_133 = arith.constant 5.000000e-01 : f32
    %375 = vector.broadcast %cst_133 : f32 to vector<8x32xf32>
    %376 = arith.mulf %375, %374 : vector<8x32xf32>
    %cst_134 = arith.constant 5.000000e-01 : f32
    %377 = vector.broadcast %cst_134 : f32 to vector<8x32xf32>
    %378 = arith.addf %376, %377 : vector<8x32xf32>
    %379 = arith.mulf %368, %296 : vector<8x32xf32>
    %380 = arith.mulf %360, %370 : vector<8x32xf32>
    %381 = arith.addf %379, %380 : vector<8x32xf32>
    %382 = math.tanh %381 : vector<8x32xf32>
    %383 = arith.mulf %378, %382 : vector<8x32xf32>
    %384 = arith.index_cast %345 : i32 to index
    %c0_135 = arith.constant 0 : index
    %c0_136 = arith.constant 0 : index
    %385 = vector.load %arg1[%384, %c0_135, %c0_136] : memref<8x8x16xf32, #tpu.memory_space<vmem>>, vector<1x8x16xf32>
    %386 = vector.shape_cast %385 : vector<1x8x16xf32> to vector<8x16xf32>
    %387 = tpu.concatenate %386, %336 in 1 : vector<8x16xf32>, vector<8x32xf32> -> vector<8x48xf32>
    %cst_137 = arith.constant dense<0.000000e+00> : vector<8x128xf32>
    %388 = tpu.matmul %387, %1, %cst_137 {dimension_numbers = #tpu.dot_dimension_numbers<[1], [0], [0], [1], [0, 0, 1, 1], [], []>} : vector<8x48xf32>, vector<48x128xf32>, vector<8x128xf32> -> vector<8x128xf32>
    %389 = vector.broadcast %3 : vector<1x128xf32> to vector<8x128xf32>
    %390 = arith.addf %388, %389 : vector<8x128xf32>
    %391 = vector.extract_strided_slice %390 {offsets = [0, 0], sizes = [8, 32], strides = [1, 1]} : vector<8x128xf32> to vector<8x32xf32>
    %cst_138 = arith.constant 5.000000e-01 : f32
    %392 = vector.broadcast %cst_138 : f32 to vector<8x32xf32>
    %393 = arith.mulf %392, %391 : vector<8x32xf32>
    %394 = math.tanh %393 : vector<8x32xf32>
    %cst_139 = arith.constant 5.000000e-01 : f32
    %395 = vector.broadcast %cst_139 : f32 to vector<8x32xf32>
    %396 = arith.mulf %395, %394 : vector<8x32xf32>
    %cst_140 = arith.constant 5.000000e-01 : f32
    %397 = vector.broadcast %cst_140 : f32 to vector<8x32xf32>
    %398 = arith.addf %396, %397 : vector<8x32xf32>
    %399 = vector.extract_strided_slice %390 {offsets = [0, 32], sizes = [8, 32], strides = [1, 1]} : vector<8x128xf32> to vector<8x32xf32>
    %cst_141 = arith.constant 5.000000e-01 : f32
    %400 = vector.broadcast %cst_141 : f32 to vector<8x32xf32>
    %401 = arith.mulf %400, %399 : vector<8x32xf32>
    %402 = math.tanh %401 : vector<8x32xf32>
    %cst_142 = arith.constant 5.000000e-01 : f32
    %403 = vector.broadcast %cst_142 : f32 to vector<8x32xf32>
    %404 = arith.mulf %403, %402 : vector<8x32xf32>
    %cst_143 = arith.constant 5.000000e-01 : f32
    %405 = vector.broadcast %cst_143 : f32 to vector<8x32xf32>
    %406 = arith.addf %404, %405 : vector<8x32xf32>
    %407 = vector.extract_strided_slice %390 {offsets = [0, 64], sizes = [8, 32], strides = [1, 1]} : vector<8x128xf32> to vector<8x32xf32>
    %408 = math.tanh %407 : vector<8x32xf32>
    %409 = vector.extract_strided_slice %390 {offsets = [0, 96], sizes = [8, 32], strides = [1, 1]} : vector<8x128xf32> to vector<8x32xf32>
    %cst_144 = arith.constant 5.000000e-01 : f32
    %410 = vector.broadcast %cst_144 : f32 to vector<8x32xf32>
    %411 = arith.mulf %410, %409 : vector<8x32xf32>
    %412 = math.tanh %411 : vector<8x32xf32>
    %cst_145 = arith.constant 5.000000e-01 : f32
    %413 = vector.broadcast %cst_145 : f32 to vector<8x32xf32>
    %414 = arith.mulf %413, %412 : vector<8x32xf32>
    %cst_146 = arith.constant 5.000000e-01 : f32
    %415 = vector.broadcast %cst_146 : f32 to vector<8x32xf32>
    %416 = arith.addf %414, %415 : vector<8x32xf32>
    %417 = arith.mulf %406, %334 : vector<8x32xf32>
    %418 = arith.mulf %398, %408 : vector<8x32xf32>
    %419 = arith.addf %417, %418 : vector<8x32xf32>
    %420 = math.tanh %419 : vector<8x32xf32>
    %421 = arith.mulf %416, %420 : vector<8x32xf32>
    %422 = arith.index_cast %c4_i32 : i32 to index
    %c0_147 = arith.constant 0 : index
    %c0_148 = arith.constant 0 : index
    %423 = vector.load %arg7[%422, %c0_147, %c0_148] : memref<8x8x32xf32, #tpu.memory_space<vmem>>, vector<1x8x32xf32>
    %424 = vector.shape_cast %423 : vector<1x8x32xf32> to vector<8x32xf32>
    %425 = vector.shape_cast %383 : vector<8x32xf32> to vector<1x8x32xf32>
    tpu.vector_store %arg7[%422, %c0_147, %c0_148], %425 {strides = array<i32>} : memref<8x8x32xf32, #tpu.memory_space<vmem>>, vector<1x8x32xf32>,
    %426 = arith.index_cast %345 : i32 to index
    %c0_149 = arith.constant 0 : index
    %c0_150 = arith.constant 0 : index
    %427 = vector.load %arg8[%426, %c0_149, %c0_150] : memref<8x8x32xf32, #tpu.memory_space<vmem>>, vector<1x8x32xf32>
    %428 = vector.shape_cast %427 : vector<1x8x32xf32> to vector<8x32xf32>
    %429 = vector.shape_cast %421 : vector<8x32xf32> to vector<1x8x32xf32>
    tpu.vector_store %arg8[%426, %c0_149, %c0_150], %429 {strides = array<i32>} : memref<8x8x32xf32, #tpu.memory_space<vmem>>, vector<1x8x32xf32>,
    %c5_i32 = arith.constant 5 : i32
    %c7_i32_151 = arith.constant 7 : i32
    %430 = arith.subi %c7_i32_151, %c5_i32 : i32
    %431 = arith.index_cast %c5_i32 : i32 to index
    %c0_152 = arith.constant 0 : index
    %c0_153 = arith.constant 0 : index
    %432 = vector.load %arg1[%431, %c0_152, %c0_153] : memref<8x8x16xf32, #tpu.memory_space<vmem>>, vector<1x8x16xf32>
    %433 = vector.shape_cast %432 : vector<1x8x16xf32> to vector<8x16xf32>
    %434 = tpu.concatenate %433, %383 in 1 : vector<8x16xf32>, vector<8x32xf32> -> vector<8x48xf32>
    %cst_154 = arith.constant dense<0.000000e+00> : vector<8x128xf32>
    %435 = tpu.matmul %434, %0, %cst_154 {dimension_numbers = #tpu.dot_dimension_numbers<[1], [0], [0], [1], [0, 0, 1, 1], [], []>} : vector<8x48xf32>, vector<48x128xf32>, vector<8x128xf32> -> vector<8x128xf32>
    %436 = vector.broadcast %2 : vector<1x128xf32> to vector<8x128xf32>
    %437 = arith.addf %435, %436 : vector<8x128xf32>
    %438 = vector.extract_strided_slice %437 {offsets = [0, 0], sizes = [8, 32], strides = [1, 1]} : vector<8x128xf32> to vector<8x32xf32>
    %cst_155 = arith.constant 5.000000e-01 : f32
    %439 = vector.broadcast %cst_155 : f32 to vector<8x32xf32>
    %440 = arith.mulf %439, %438 : vector<8x32xf32>
    %441 = math.tanh %440 : vector<8x32xf32>
    %cst_156 = arith.constant 5.000000e-01 : f32
    %442 = vector.broadcast %cst_156 : f32 to vector<8x32xf32>
    %443 = arith.mulf %442, %441 : vector<8x32xf32>
    %cst_157 = arith.constant 5.000000e-01 : f32
    %444 = vector.broadcast %cst_157 : f32 to vector<8x32xf32>
    %445 = arith.addf %443, %444 : vector<8x32xf32>
    %446 = vector.extract_strided_slice %437 {offsets = [0, 32], sizes = [8, 32], strides = [1, 1]} : vector<8x128xf32> to vector<8x32xf32>
    %cst_158 = arith.constant 5.000000e-01 : f32
    %447 = vector.broadcast %cst_158 : f32 to vector<8x32xf32>
    %448 = arith.mulf %447, %446 : vector<8x32xf32>
    %449 = math.tanh %448 : vector<8x32xf32>
    %cst_159 = arith.constant 5.000000e-01 : f32
    %450 = vector.broadcast %cst_159 : f32 to vector<8x32xf32>
    %451 = arith.mulf %450, %449 : vector<8x32xf32>
    %cst_160 = arith.constant 5.000000e-01 : f32
    %452 = vector.broadcast %cst_160 : f32 to vector<8x32xf32>
    %453 = arith.addf %451, %452 : vector<8x32xf32>
    %454 = vector.extract_strided_slice %437 {offsets = [0, 64], sizes = [8, 32], strides = [1, 1]} : vector<8x128xf32> to vector<8x32xf32>
    %455 = math.tanh %454 : vector<8x32xf32>
    %456 = vector.extract_strided_slice %437 {offsets = [0, 96], sizes = [8, 32], strides = [1, 1]} : vector<8x128xf32> to vector<8x32xf32>
    %cst_161 = arith.constant 5.000000e-01 : f32
    %457 = vector.broadcast %cst_161 : f32 to vector<8x32xf32>
    %458 = arith.mulf %457, %456 : vector<8x32xf32>
    %459 = math.tanh %458 : vector<8x32xf32>
    %cst_162 = arith.constant 5.000000e-01 : f32
    %460 = vector.broadcast %cst_162 : f32 to vector<8x32xf32>
    %461 = arith.mulf %460, %459 : vector<8x32xf32>
    %cst_163 = arith.constant 5.000000e-01 : f32
    %462 = vector.broadcast %cst_163 : f32 to vector<8x32xf32>
    %463 = arith.addf %461, %462 : vector<8x32xf32>
    %464 = arith.mulf %453, %381 : vector<8x32xf32>
    %465 = arith.mulf %445, %455 : vector<8x32xf32>
    %466 = arith.addf %464, %465 : vector<8x32xf32>
    %467 = math.tanh %466 : vector<8x32xf32>
    %468 = arith.mulf %463, %467 : vector<8x32xf32>
    %469 = arith.index_cast %430 : i32 to index
    %c0_164 = arith.constant 0 : index
    %c0_165 = arith.constant 0 : index
    %470 = vector.load %arg1[%469, %c0_164, %c0_165] : memref<8x8x16xf32, #tpu.memory_space<vmem>>, vector<1x8x16xf32>
    %471 = vector.shape_cast %470 : vector<1x8x16xf32> to vector<8x16xf32>
    %472 = tpu.concatenate %471, %421 in 1 : vector<8x16xf32>, vector<8x32xf32> -> vector<8x48xf32>
    %cst_166 = arith.constant dense<0.000000e+00> : vector<8x128xf32>
    %473 = tpu.matmul %472, %1, %cst_166 {dimension_numbers = #tpu.dot_dimension_numbers<[1], [0], [0], [1], [0, 0, 1, 1], [], []>} : vector<8x48xf32>, vector<48x128xf32>, vector<8x128xf32> -> vector<8x128xf32>
    %474 = vector.broadcast %3 : vector<1x128xf32> to vector<8x128xf32>
    %475 = arith.addf %473, %474 : vector<8x128xf32>
    %476 = vector.extract_strided_slice %475 {offsets = [0, 0], sizes = [8, 32], strides = [1, 1]} : vector<8x128xf32> to vector<8x32xf32>
    %cst_167 = arith.constant 5.000000e-01 : f32
    %477 = vector.broadcast %cst_167 : f32 to vector<8x32xf32>
    %478 = arith.mulf %477, %476 : vector<8x32xf32>
    %479 = math.tanh %478 : vector<8x32xf32>
    %cst_168 = arith.constant 5.000000e-01 : f32
    %480 = vector.broadcast %cst_168 : f32 to vector<8x32xf32>
    %481 = arith.mulf %480, %479 : vector<8x32xf32>
    %cst_169 = arith.constant 5.000000e-01 : f32
    %482 = vector.broadcast %cst_169 : f32 to vector<8x32xf32>
    %483 = arith.addf %481, %482 : vector<8x32xf32>
    %484 = vector.extract_strided_slice %475 {offsets = [0, 32], sizes = [8, 32], strides = [1, 1]} : vector<8x128xf32> to vector<8x32xf32>
    %cst_170 = arith.constant 5.000000e-01 : f32
    %485 = vector.broadcast %cst_170 : f32 to vector<8x32xf32>
    %486 = arith.mulf %485, %484 : vector<8x32xf32>
    %487 = math.tanh %486 : vector<8x32xf32>
    %cst_171 = arith.constant 5.000000e-01 : f32
    %488 = vector.broadcast %cst_171 : f32 to vector<8x32xf32>
    %489 = arith.mulf %488, %487 : vector<8x32xf32>
    %cst_172 = arith.constant 5.000000e-01 : f32
    %490 = vector.broadcast %cst_172 : f32 to vector<8x32xf32>
    %491 = arith.addf %489, %490 : vector<8x32xf32>
    %492 = vector.extract_strided_slice %475 {offsets = [0, 64], sizes = [8, 32], strides = [1, 1]} : vector<8x128xf32> to vector<8x32xf32>
    %493 = math.tanh %492 : vector<8x32xf32>
    %494 = vector.extract_strided_slice %475 {offsets = [0, 96], sizes = [8, 32], strides = [1, 1]} : vector<8x128xf32> to vector<8x32xf32>
    %cst_173 = arith.constant 5.000000e-01 : f32
    %495 = vector.broadcast %cst_173 : f32 to vector<8x32xf32>
    %496 = arith.mulf %495, %494 : vector<8x32xf32>
    %497 = math.tanh %496 : vector<8x32xf32>
    %cst_174 = arith.constant 5.000000e-01 : f32
    %498 = vector.broadcast %cst_174 : f32 to vector<8x32xf32>
    %499 = arith.mulf %498, %497 : vector<8x32xf32>
    %cst_175 = arith.constant 5.000000e-01 : f32
    %500 = vector.broadcast %cst_175 : f32 to vector<8x32xf32>
    %501 = arith.addf %499, %500 : vector<8x32xf32>
    %502 = arith.mulf %491, %419 : vector<8x32xf32>
    %503 = arith.mulf %483, %493 : vector<8x32xf32>
    %504 = arith.addf %502, %503 : vector<8x32xf32>
    %505 = math.tanh %504 : vector<8x32xf32>
    %506 = arith.mulf %501, %505 : vector<8x32xf32>
    %507 = arith.index_cast %c5_i32 : i32 to index
    %c0_176 = arith.constant 0 : index
    %c0_177 = arith.constant 0 : index
    %508 = vector.load %arg7[%507, %c0_176, %c0_177] : memref<8x8x32xf32, #tpu.memory_space<vmem>>, vector<1x8x32xf32>
    %509 = vector.shape_cast %508 : vector<1x8x32xf32> to vector<8x32xf32>
    %510 = vector.shape_cast %468 : vector<8x32xf32> to vector<1x8x32xf32>
    tpu.vector_store %arg7[%507, %c0_176, %c0_177], %510 {strides = array<i32>} : memref<8x8x32xf32, #tpu.memory_space<vmem>>, vector<1x8x32xf32>,
    %511 = arith.index_cast %430 : i32 to index
    %c0_178 = arith.constant 0 : index
    %c0_179 = arith.constant 0 : index
    %512 = vector.load %arg8[%511, %c0_178, %c0_179] : memref<8x8x32xf32, #tpu.memory_space<vmem>>, vector<1x8x32xf32>
    %513 = vector.shape_cast %512 : vector<1x8x32xf32> to vector<8x32xf32>
    %514 = vector.shape_cast %506 : vector<8x32xf32> to vector<1x8x32xf32>
    tpu.vector_store %arg8[%511, %c0_178, %c0_179], %514 {strides = array<i32>} : memref<8x8x32xf32, #tpu.memory_space<vmem>>, vector<1x8x32xf32>,
    %c6_i32 = arith.constant 6 : i32
    %c7_i32_180 = arith.constant 7 : i32
    %515 = arith.subi %c7_i32_180, %c6_i32 : i32
    %516 = arith.index_cast %c6_i32 : i32 to index
    %c0_181 = arith.constant 0 : index
    %c0_182 = arith.constant 0 : index
    %517 = vector.load %arg1[%516, %c0_181, %c0_182] : memref<8x8x16xf32, #tpu.memory_space<vmem>>, vector<1x8x16xf32>
    %518 = vector.shape_cast %517 : vector<1x8x16xf32> to vector<8x16xf32>
    %519 = tpu.concatenate %518, %468 in 1 : vector<8x16xf32>, vector<8x32xf32> -> vector<8x48xf32>
    %cst_183 = arith.constant dense<0.000000e+00> : vector<8x128xf32>
    %520 = tpu.matmul %519, %0, %cst_183 {dimension_numbers = #tpu.dot_dimension_numbers<[1], [0], [0], [1], [0, 0, 1, 1], [], []>} : vector<8x48xf32>, vector<48x128xf32>, vector<8x128xf32> -> vector<8x128xf32>
    %521 = vector.broadcast %2 : vector<1x128xf32> to vector<8x128xf32>
    %522 = arith.addf %520, %521 : vector<8x128xf32>
    %523 = vector.extract_strided_slice %522 {offsets = [0, 0], sizes = [8, 32], strides = [1, 1]} : vector<8x128xf32> to vector<8x32xf32>
    %cst_184 = arith.constant 5.000000e-01 : f32
    %524 = vector.broadcast %cst_184 : f32 to vector<8x32xf32>
    %525 = arith.mulf %524, %523 : vector<8x32xf32>
    %526 = math.tanh %525 : vector<8x32xf32>
    %cst_185 = arith.constant 5.000000e-01 : f32
    %527 = vector.broadcast %cst_185 : f32 to vector<8x32xf32>
    %528 = arith.mulf %527, %526 : vector<8x32xf32>
    %cst_186 = arith.constant 5.000000e-01 : f32
    %529 = vector.broadcast %cst_186 : f32 to vector<8x32xf32>
    %530 = arith.addf %528, %529 : vector<8x32xf32>
    %531 = vector.extract_strided_slice %522 {offsets = [0, 32], sizes = [8, 32], strides = [1, 1]} : vector<8x128xf32> to vector<8x32xf32>
    %cst_187 = arith.constant 5.000000e-01 : f32
    %532 = vector.broadcast %cst_187 : f32 to vector<8x32xf32>
    %533 = arith.mulf %532, %531 : vector<8x32xf32>
    %534 = math.tanh %533 : vector<8x32xf32>
    %cst_188 = arith.constant 5.000000e-01 : f32
    %535 = vector.broadcast %cst_188 : f32 to vector<8x32xf32>
    %536 = arith.mulf %535, %534 : vector<8x32xf32>
    %cst_189 = arith.constant 5.000000e-01 : f32
    %537 = vector.broadcast %cst_189 : f32 to vector<8x32xf32>
    %538 = arith.addf %536, %537 : vector<8x32xf32>
    %539 = vector.extract_strided_slice %522 {offsets = [0, 64], sizes = [8, 32], strides = [1, 1]} : vector<8x128xf32> to vector<8x32xf32>
    %540 = math.tanh %539 : vector<8x32xf32>
    %541 = vector.extract_strided_slice %522 {offsets = [0, 96], sizes = [8, 32], strides = [1, 1]} : vector<8x128xf32> to vector<8x32xf32>
    %cst_190 = arith.constant 5.000000e-01 : f32
    %542 = vector.broadcast %cst_190 : f32 to vector<8x32xf32>
    %543 = arith.mulf %542, %541 : vector<8x32xf32>
    %544 = math.tanh %543 : vector<8x32xf32>
    %cst_191 = arith.constant 5.000000e-01 : f32
    %545 = vector.broadcast %cst_191 : f32 to vector<8x32xf32>
    %546 = arith.mulf %545, %544 : vector<8x32xf32>
    %cst_192 = arith.constant 5.000000e-01 : f32
    %547 = vector.broadcast %cst_192 : f32 to vector<8x32xf32>
    %548 = arith.addf %546, %547 : vector<8x32xf32>
    %549 = arith.mulf %538, %466 : vector<8x32xf32>
    %550 = arith.mulf %530, %540 : vector<8x32xf32>
    %551 = arith.addf %549, %550 : vector<8x32xf32>
    %552 = math.tanh %551 : vector<8x32xf32>
    %553 = arith.mulf %548, %552 : vector<8x32xf32>
    %554 = arith.index_cast %515 : i32 to index
    %c0_193 = arith.constant 0 : index
    %c0_194 = arith.constant 0 : index
    %555 = vector.load %arg1[%554, %c0_193, %c0_194] : memref<8x8x16xf32, #tpu.memory_space<vmem>>, vector<1x8x16xf32>
    %556 = vector.shape_cast %555 : vector<1x8x16xf32> to vector<8x16xf32>
    %557 = tpu.concatenate %556, %506 in 1 : vector<8x16xf32>, vector<8x32xf32> -> vector<8x48xf32>
    %cst_195 = arith.constant dense<0.000000e+00> : vector<8x128xf32>
    %558 = tpu.matmul %557, %1, %cst_195 {dimension_numbers = #tpu.dot_dimension_numbers<[1], [0], [0], [1], [0, 0, 1, 1], [], []>} : vector<8x48xf32>, vector<48x128xf32>, vector<8x128xf32> -> vector<8x128xf32>
    %559 = vector.broadcast %3 : vector<1x128xf32> to vector<8x128xf32>
    %560 = arith.addf %558, %559 : vector<8x128xf32>
    %561 = vector.extract_strided_slice %560 {offsets = [0, 0], sizes = [8, 32], strides = [1, 1]} : vector<8x128xf32> to vector<8x32xf32>
    %cst_196 = arith.constant 5.000000e-01 : f32
    %562 = vector.broadcast %cst_196 : f32 to vector<8x32xf32>
    %563 = arith.mulf %562, %561 : vector<8x32xf32>
    %564 = math.tanh %563 : vector<8x32xf32>
    %cst_197 = arith.constant 5.000000e-01 : f32
    %565 = vector.broadcast %cst_197 : f32 to vector<8x32xf32>
    %566 = arith.mulf %565, %564 : vector<8x32xf32>
    %cst_198 = arith.constant 5.000000e-01 : f32
    %567 = vector.broadcast %cst_198 : f32 to vector<8x32xf32>
    %568 = arith.addf %566, %567 : vector<8x32xf32>
    %569 = vector.extract_strided_slice %560 {offsets = [0, 32], sizes = [8, 32], strides = [1, 1]} : vector<8x128xf32> to vector<8x32xf32>
    %cst_199 = arith.constant 5.000000e-01 : f32
    %570 = vector.broadcast %cst_199 : f32 to vector<8x32xf32>
    %571 = arith.mulf %570, %569 : vector<8x32xf32>
    %572 = math.tanh %571 : vector<8x32xf32>
    %cst_200 = arith.constant 5.000000e-01 : f32
    %573 = vector.broadcast %cst_200 : f32 to vector<8x32xf32>
    %574 = arith.mulf %573, %572 : vector<8x32xf32>
    %cst_201 = arith.constant 5.000000e-01 : f32
    %575 = vector.broadcast %cst_201 : f32 to vector<8x32xf32>
    %576 = arith.addf %574, %575 : vector<8x32xf32>
    %577 = vector.extract_strided_slice %560 {offsets = [0, 64], sizes = [8, 32], strides = [1, 1]} : vector<8x128xf32> to vector<8x32xf32>
    %578 = math.tanh %577 : vector<8x32xf32>
    %579 = vector.extract_strided_slice %560 {offsets = [0, 96], sizes = [8, 32], strides = [1, 1]} : vector<8x128xf32> to vector<8x32xf32>
    %cst_202 = arith.constant 5.000000e-01 : f32
    %580 = vector.broadcast %cst_202 : f32 to vector<8x32xf32>
    %581 = arith.mulf %580, %579 : vector<8x32xf32>
    %582 = math.tanh %581 : vector<8x32xf32>
    %cst_203 = arith.constant 5.000000e-01 : f32
    %583 = vector.broadcast %cst_203 : f32 to vector<8x32xf32>
    %584 = arith.mulf %583, %582 : vector<8x32xf32>
    %cst_204 = arith.constant 5.000000e-01 : f32
    %585 = vector.broadcast %cst_204 : f32 to vector<8x32xf32>
    %586 = arith.addf %584, %585 : vector<8x32xf32>
    %587 = arith.mulf %576, %504 : vector<8x32xf32>
    %588 = arith.mulf %568, %578 : vector<8x32xf32>
    %589 = arith.addf %587, %588 : vector<8x32xf32>
    %590 = math.tanh %589 : vector<8x32xf32>
    %591 = arith.mulf %586, %590 : vector<8x32xf32>
    %592 = arith.index_cast %c6_i32 : i32 to index
    %c0_205 = arith.constant 0 : index
    %c0_206 = arith.constant 0 : index
    %593 = vector.load %arg7[%592, %c0_205, %c0_206] : memref<8x8x32xf32, #tpu.memory_space<vmem>>, vector<1x8x32xf32>
    %594 = vector.shape_cast %593 : vector<1x8x32xf32> to vector<8x32xf32>
    %595 = vector.shape_cast %553 : vector<8x32xf32> to vector<1x8x32xf32>
    tpu.vector_store %arg7[%592, %c0_205, %c0_206], %595 {strides = array<i32>} : memref<8x8x32xf32, #tpu.memory_space<vmem>>, vector<1x8x32xf32>,
    %596 = arith.index_cast %515 : i32 to index
    %c0_207 = arith.constant 0 : index
    %c0_208 = arith.constant 0 : index
    %597 = vector.load %arg8[%596, %c0_207, %c0_208] : memref<8x8x32xf32, #tpu.memory_space<vmem>>, vector<1x8x32xf32>
    %598 = vector.shape_cast %597 : vector<1x8x32xf32> to vector<8x32xf32>
    %599 = vector.shape_cast %591 : vector<8x32xf32> to vector<1x8x32xf32>
    tpu.vector_store %arg8[%596, %c0_207, %c0_208], %599 {strides = array<i32>} : memref<8x8x32xf32, #tpu.memory_space<vmem>>, vector<1x8x32xf32>,
    %c7_i32_209 = arith.constant 7 : i32
    %c7_i32_210 = arith.constant 7 : i32
    %600 = arith.subi %c7_i32_210, %c7_i32_209 : i32
    %601 = arith.index_cast %c7_i32_209 : i32 to index
    %c0_211 = arith.constant 0 : index
    %c0_212 = arith.constant 0 : index
    %602 = vector.load %arg1[%601, %c0_211, %c0_212] : memref<8x8x16xf32, #tpu.memory_space<vmem>>, vector<1x8x16xf32>
    %603 = vector.shape_cast %602 : vector<1x8x16xf32> to vector<8x16xf32>
    %604 = tpu.concatenate %603, %553 in 1 : vector<8x16xf32>, vector<8x32xf32> -> vector<8x48xf32>
    %cst_213 = arith.constant dense<0.000000e+00> : vector<8x128xf32>
    %605 = tpu.matmul %604, %0, %cst_213 {dimension_numbers = #tpu.dot_dimension_numbers<[1], [0], [0], [1], [0, 0, 1, 1], [], []>} : vector<8x48xf32>, vector<48x128xf32>, vector<8x128xf32> -> vector<8x128xf32>
    %606 = vector.broadcast %2 : vector<1x128xf32> to vector<8x128xf32>
    %607 = arith.addf %605, %606 : vector<8x128xf32>
    %608 = vector.extract_strided_slice %607 {offsets = [0, 0], sizes = [8, 32], strides = [1, 1]} : vector<8x128xf32> to vector<8x32xf32>
    %cst_214 = arith.constant 5.000000e-01 : f32
    %609 = vector.broadcast %cst_214 : f32 to vector<8x32xf32>
    %610 = arith.mulf %609, %608 : vector<8x32xf32>
    %611 = math.tanh %610 : vector<8x32xf32>
    %cst_215 = arith.constant 5.000000e-01 : f32
    %612 = vector.broadcast %cst_215 : f32 to vector<8x32xf32>
    %613 = arith.mulf %612, %611 : vector<8x32xf32>
    %cst_216 = arith.constant 5.000000e-01 : f32
    %614 = vector.broadcast %cst_216 : f32 to vector<8x32xf32>
    %615 = arith.addf %613, %614 : vector<8x32xf32>
    %616 = vector.extract_strided_slice %607 {offsets = [0, 32], sizes = [8, 32], strides = [1, 1]} : vector<8x128xf32> to vector<8x32xf32>
    %cst_217 = arith.constant 5.000000e-01 : f32
    %617 = vector.broadcast %cst_217 : f32 to vector<8x32xf32>
    %618 = arith.mulf %617, %616 : vector<8x32xf32>
    %619 = math.tanh %618 : vector<8x32xf32>
    %cst_218 = arith.constant 5.000000e-01 : f32
    %620 = vector.broadcast %cst_218 : f32 to vector<8x32xf32>
    %621 = arith.mulf %620, %619 : vector<8x32xf32>
    %cst_219 = arith.constant 5.000000e-01 : f32
    %622 = vector.broadcast %cst_219 : f32 to vector<8x32xf32>
    %623 = arith.addf %621, %622 : vector<8x32xf32>
    %624 = vector.extract_strided_slice %607 {offsets = [0, 64], sizes = [8, 32], strides = [1, 1]} : vector<8x128xf32> to vector<8x32xf32>
    %625 = math.tanh %624 : vector<8x32xf32>
    %626 = vector.extract_strided_slice %607 {offsets = [0, 96], sizes = [8, 32], strides = [1, 1]} : vector<8x128xf32> to vector<8x32xf32>
    %cst_220 = arith.constant 5.000000e-01 : f32
    %627 = vector.broadcast %cst_220 : f32 to vector<8x32xf32>
    %628 = arith.mulf %627, %626 : vector<8x32xf32>
    %629 = math.tanh %628 : vector<8x32xf32>
    %cst_221 = arith.constant 5.000000e-01 : f32
    %630 = vector.broadcast %cst_221 : f32 to vector<8x32xf32>
    %631 = arith.mulf %630, %629 : vector<8x32xf32>
    %cst_222 = arith.constant 5.000000e-01 : f32
    %632 = vector.broadcast %cst_222 : f32 to vector<8x32xf32>
    %633 = arith.addf %631, %632 : vector<8x32xf32>
    %634 = arith.mulf %623, %551 : vector<8x32xf32>
    %635 = arith.mulf %615, %625 : vector<8x32xf32>
    %636 = arith.addf %634, %635 : vector<8x32xf32>
    %637 = math.tanh %636 : vector<8x32xf32>
    %638 = arith.mulf %633, %637 : vector<8x32xf32>
    %639 = arith.index_cast %600 : i32 to index
    %c0_223 = arith.constant 0 : index
    %c0_224 = arith.constant 0 : index
    %640 = vector.load %arg1[%639, %c0_223, %c0_224] : memref<8x8x16xf32, #tpu.memory_space<vmem>>, vector<1x8x16xf32>
    %641 = vector.shape_cast %640 : vector<1x8x16xf32> to vector<8x16xf32>
    %642 = tpu.concatenate %641, %591 in 1 : vector<8x16xf32>, vector<8x32xf32> -> vector<8x48xf32>
    %cst_225 = arith.constant dense<0.000000e+00> : vector<8x128xf32>
    %643 = tpu.matmul %642, %1, %cst_225 {dimension_numbers = #tpu.dot_dimension_numbers<[1], [0], [0], [1], [0, 0, 1, 1], [], []>} : vector<8x48xf32>, vector<48x128xf32>, vector<8x128xf32> -> vector<8x128xf32>
    %644 = vector.broadcast %3 : vector<1x128xf32> to vector<8x128xf32>
    %645 = arith.addf %643, %644 : vector<8x128xf32>
    %646 = vector.extract_strided_slice %645 {offsets = [0, 0], sizes = [8, 32], strides = [1, 1]} : vector<8x128xf32> to vector<8x32xf32>
    %cst_226 = arith.constant 5.000000e-01 : f32
    %647 = vector.broadcast %cst_226 : f32 to vector<8x32xf32>
    %648 = arith.mulf %647, %646 : vector<8x32xf32>
    %649 = math.tanh %648 : vector<8x32xf32>
    %cst_227 = arith.constant 5.000000e-01 : f32
    %650 = vector.broadcast %cst_227 : f32 to vector<8x32xf32>
    %651 = arith.mulf %650, %649 : vector<8x32xf32>
    %cst_228 = arith.constant 5.000000e-01 : f32
    %652 = vector.broadcast %cst_228 : f32 to vector<8x32xf32>
    %653 = arith.addf %651, %652 : vector<8x32xf32>
    %654 = vector.extract_strided_slice %645 {offsets = [0, 32], sizes = [8, 32], strides = [1, 1]} : vector<8x128xf32> to vector<8x32xf32>
    %cst_229 = arith.constant 5.000000e-01 : f32
    %655 = vector.broadcast %cst_229 : f32 to vector<8x32xf32>
    %656 = arith.mulf %655, %654 : vector<8x32xf32>
    %657 = math.tanh %656 : vector<8x32xf32>
    %cst_230 = arith.constant 5.000000e-01 : f32
    %658 = vector.broadcast %cst_230 : f32 to vector<8x32xf32>
    %659 = arith.mulf %658, %657 : vector<8x32xf32>
    %cst_231 = arith.constant 5.000000e-01 : f32
    %660 = vector.broadcast %cst_231 : f32 to vector<8x32xf32>
    %661 = arith.addf %659, %660 : vector<8x32xf32>
    %662 = vector.extract_strided_slice %645 {offsets = [0, 64], sizes = [8, 32], strides = [1, 1]} : vector<8x128xf32> to vector<8x32xf32>
    %663 = math.tanh %662 : vector<8x32xf32>
    %664 = vector.extract_strided_slice %645 {offsets = [0, 96], sizes = [8, 32], strides = [1, 1]} : vector<8x128xf32> to vector<8x32xf32>
    %cst_232 = arith.constant 5.000000e-01 : f32
    %665 = vector.broadcast %cst_232 : f32 to vector<8x32xf32>
    %666 = arith.mulf %665, %664 : vector<8x32xf32>
    %667 = math.tanh %666 : vector<8x32xf32>
    %cst_233 = arith.constant 5.000000e-01 : f32
    %668 = vector.broadcast %cst_233 : f32 to vector<8x32xf32>
    %669 = arith.mulf %668, %667 : vector<8x32xf32>
    %cst_234 = arith.constant 5.000000e-01 : f32
    %670 = vector.broadcast %cst_234 : f32 to vector<8x32xf32>
    %671 = arith.addf %669, %670 : vector<8x32xf32>
    %672 = arith.mulf %661, %589 : vector<8x32xf32>
    %673 = arith.mulf %653, %663 : vector<8x32xf32>
    %674 = arith.addf %672, %673 : vector<8x32xf32>
    %675 = math.tanh %674 : vector<8x32xf32>
    %676 = arith.mulf %671, %675 : vector<8x32xf32>
    %677 = arith.index_cast %c7_i32_209 : i32 to index
    %c0_235 = arith.constant 0 : index
    %c0_236 = arith.constant 0 : index
    %678 = vector.load %arg7[%677, %c0_235, %c0_236] : memref<8x8x32xf32, #tpu.memory_space<vmem>>, vector<1x8x32xf32>
    %679 = vector.shape_cast %678 : vector<1x8x32xf32> to vector<8x32xf32>
    %680 = vector.shape_cast %638 : vector<8x32xf32> to vector<1x8x32xf32>
    tpu.vector_store %arg7[%677, %c0_235, %c0_236], %680 {strides = array<i32>} : memref<8x8x32xf32, #tpu.memory_space<vmem>>, vector<1x8x32xf32>,
    %681 = arith.index_cast %600 : i32 to index
    %c0_237 = arith.constant 0 : index
    %c0_238 = arith.constant 0 : index
    %682 = vector.load %arg8[%681, %c0_237, %c0_238] : memref<8x8x32xf32, #tpu.memory_space<vmem>>, vector<1x8x32xf32>
    %683 = vector.shape_cast %682 : vector<1x8x32xf32> to vector<8x32xf32>
    %684 = vector.shape_cast %676 : vector<8x32xf32> to vector<1x8x32xf32>
    tpu.vector_store %arg8[%681, %c0_237, %c0_238], %684 {strides = array<i32>} : memref<8x8x32xf32, #tpu.memory_space<vmem>>, vector<1x8x32xf32>,
    %c8_i32 = arith.constant 8 : i32
    %c0_239 = arith.constant 0 : index
    %c0_240 = arith.constant 0 : index
    %c0_241 = arith.constant 0 : index
    %685 = vector.load %arg7[%c0_239, %c0_240, %c0_241] : memref<8x8x32xf32, #tpu.memory_space<vmem>>, vector<8x8x32xf32>
    %c0_242 = arith.constant 0 : index
    %c0_243 = arith.constant 0 : index
    %c0_244 = arith.constant 0 : index
    %686 = vector.load %arg8[%c0_242, %c0_243, %c0_244] : memref<8x8x32xf32, #tpu.memory_space<vmem>>, vector<8x8x32xf32>
    %687 = tpu.concatenate %685, %686 in 2 : vector<8x8x32xf32>, vector<8x8x32xf32> -> vector<8x8x64xf32>
    %c0_245 = arith.constant 0 : index
    %c0_246 = arith.constant 0 : index
    %c0_247 = arith.constant 0 : index
    %688 = vector.load %arg6[%c0_245, %c0_246, %c0_247] : memref<8x8x64xf32, #tpu.memory_space<vmem>>, vector<8x8x64xf32>
    tpu.vector_store %arg6[%c0_245, %c0_246, %c0_247], %687 {strides = array<i32>} : memref<8x8x64xf32, #tpu.memory_space<vmem>>, vector<8x8x64xf32>,
    return
  }
  func.func @transform_0(%arg0: i32) -> (i32, i32, i32) {
    %c0_i32 = arith.constant 0 : i32
    %c0_i32_0 = arith.constant 0 : i32
    %c0_i32_1 = arith.constant 0 : i32
    %c0_i32_2 = arith.constant 0 : i32
    return %c0_i32, %c0_i32_0, %c0_i32_1 : i32, i32, i32
  }
  func.func @transform_1(%arg0: i32) -> (i32, i32) {
    %c0_i32 = arith.constant 0 : i32
    %c0_i32_0 = arith.constant 0 : i32
    %c0_i32_1 = arith.constant 0 : i32
    return %c0_i32, %c0_i32_0 : i32, i32
  }
  func.func @transform_2(%arg0: i32) -> (i32, i32) {
    %c0_i32 = arith.constant 0 : i32
    %c0_i32_0 = arith.constant 0 : i32
    %c0_i32_1 = arith.constant 0 : i32
    return %c0_i32, %c0_i32_0 : i32, i32
  }
  func.func @transform_3(%arg0: i32) -> (i32, i32) {
    %c0_i32 = arith.constant 0 : i32
    %c0_i32_0 = arith.constant 0 : i32
    %c0_i32_1 = arith.constant 0 : i32
    return %c0_i32, %c0_i32_0 : i32, i32
  }
  func.func @transform_4(%arg0: i32) -> (i32, i32) {
    %c0_i32 = arith.constant 0 : i32
    %c0_i32_0 = arith.constant 0 : i32
    %c0_i32_1 = arith.constant 0 : i32
    return %c0_i32, %c0_i32_0 : i32, i32
  }
  func.func @transform_5(%arg0: i32) -> (i32, i32, i32) {
    %c0_i32 = arith.constant 0 : i32
    %c0_i32_0 = arith.constant 0 : i32
    %c0_i32_1 = arith.constant 0 : i32
    %c0_i32_2 = arith.constant 0 : i32
    return %c0_i32, %c0_i32_0, %c0_i32_1 : i32, i32, i32
  }
}

</mosaic_0001>

<bundles_post_ra>
// kernel: tpu_custom_call.1
= control target key start
LH: loop header
LB: loop body
LE: loop exit
PB: predicated region body
PF: predicated region fallthrough
CT: control target
= control target key end

     0   :  { %10 = vsyncpa [#allocation5], 0  ;;  %s3143_s0 = inlined_call_operand.hbm [shape: f32[8,8,16], index: 0, kind: input, shape index: {}]   ;;  %s3144_s1 = inlined_call_operand.hbm [shape: f32[48,128], index: 1, kind: input, shape index: {}]   ;;  %s3145_s2 = inlined_call_operand.vmem [shape: f32[1,128], index: 2, kind: input, shape index: {}]   ;;  %s3146_s3 = inlined_call_operand.hbm [shape: f32[48,128], index: 3, kind: input, shape index: {}]   ;;  %s3147_s4 = inlined_call_operand.vmem [shape: f32[1,128], index: 4, kind: input, shape index: {}]   ;;  %s3148_s5 = inlined_call_operand.hbm [shape: f32[8,8,64], index: 5, kind: output, shape index: {}]  }
   0x1   :  { %11 = vsyncpa [#allocation8], 0 }
   0x2   :  { %12 = vsyncpa [#allocation6], 0  ;;  %s2585_s18 = smov [#allocation7]   ;;  %s2586_s20 = smov [#allocation4]  }
   0x3   :  { %s30_s19 = sshll.u32 %s2585_s18, 4  ;;  %s18_s21 = sshll.u32 %s2586_s20, 4  ;;  %s31_s19 = int_to_ptr.vmem [resolvable:$true] %s30_s19  ;;  %s2627_s21 = int_to_ptr.vmem [resolvable:$true] %s18_s21 }
   0x4   :  { %s2491_s24 = scalar_lea.hbm %s3144_s1, 768 }
   0x5   :  { %p2492_p0 = scmp.ne.s32.totalorder %s3144_s1, %s2491_s24  ;;  %p2495_p1 = scmp.lt.u32.totalorder %s2491_s24, %s3144_s1 }
   0x7   :  { %p2497_p2 = pnand %p2495_p1, %p2492_p0 }
   0x9   :  { %2500 = shalt.err (!%p2497_p2)
}
   0xa   :  { %s2501_s29 = scalar_lea.vmem %s31_s19, 768  ;;  %p2506_p4 = scmp.lt.s32.totalorder %s31_s19, %s31_s19 }
   0xb   :  { %p2502_p3 = scmp.ne.s32.totalorder %s31_s19, %s2501_s29  ;;  %p2507_p5 = scmp.lt.s32.totalorder %s2501_s29, %s2501_s29 }
   0xd   :  { %p2508_p6 = por %p2507_p5, %p2506_p4 }
   0xf   :  { %p2509_p7 = pnand %p2508_p6, %p2502_p3 }
  0x11   :  { %2512 = shalt.err (!%p2509_p7)
}
  0x12   :  { %s2587_s30 = smov 128   ;;  %s2588_s6 = smov 8  }
  0x13   :  { %36 = dma.hbm_to_vmem [thread:$0]  %s3144_s1, 768, %s31_s19, [#allocation8], %s2587_s30, %s2587_s30, %s2588_s6  }
  0x14   :  { %s2513_s11 = scalar_lea.hbm %s3143_s0, 1024 }
  0x15   :  { %p2514_p8 = scmp.ne.s32.totalorder %s3143_s0, %s2513_s11  ;;  %p2517_p9 = scmp.lt.u32.totalorder %s2513_s11, %s3143_s0 }
  0x17   :  { %p2519_p10 = pnand %p2517_p9, %p2514_p8 }
  0x19   :  { %2522 = shalt.err (!%p2519_p10)
}
  0x1a   :  { %s2523_s16 = scalar_lea.vmem %s2627_s21, 1024  ;;  %p2528_p12 = scmp.lt.s32.totalorder %s2627_s21, %s2627_s21 }
  0x1b   :  { %p2524_p11 = scmp.ne.s32.totalorder %s2627_s21, %s2523_s16  ;;  %p2529_p13 = scmp.lt.s32.totalorder %s2523_s16, %s2523_s16 }
  0x1d   :  { %p2530_p0 = por %p2529_p13, %p2528_p12 }
  0x1f   :  { %p2531_p1 = pnand %p2530_p0, %p2524_p11 }
  0x21   :  { %2534 = shalt.err (!%p2531_p1)
}
  0x22   :  { %24 = dma.hbm_to_vmem [thread:$0]  %s3143_s0, 1024, %s2627_s21, [#allocation5], %s2587_s30, %s2587_s30, %s2588_s6  }
  0x23   :  { %s2589_s18 = smov [#allocation9]   ;;  %s2535_s23 = scalar_lea.hbm %s3146_s3, 768 }
  0x24   :  { %s44_s19 = sshll.u32 %s2589_s18, 4  ;;  %p2536_p2 = scmp.ne.s32.totalorder %s3146_s3, %s2535_s23  ;;  %s45_s19 = int_to_ptr.vmem [resolvable:$true] %s44_s19 }
  0x25   :  { %p2539_p3 = scmp.lt.u32.totalorder %s2535_s23, %s3146_s3 }
  0x27   :  { %p2541_p4 = pnand %p2539_p3, %p2536_p2 }
  0x29   :  { %2544 = shalt.err (!%p2541_p4)
}
  0x2a   :  { %s2545_s28 = scalar_lea.vmem %s45_s19, 768  ;;  %p2550_p6 = scmp.lt.s32.totalorder %s45_s19, %s45_s19 }
  0x2b   :  { %p2546_p5 = scmp.ne.s32.totalorder %s45_s19, %s2545_s28  ;;  %p2551_p7 = scmp.lt.s32.totalorder %s2545_s28, %s2545_s28 }
  0x2d   :  { %p2552_p8 = por %p2551_p7, %p2550_p6 }
  0x2f   :  { %p2553_p9 = pnand %p2552_p8, %p2546_p5 }
  0x31   :  { %2556 = shalt.err (!%p2553_p9)
}
  0x32   :  { %50 = dma.hbm_to_vmem [thread:$0]  %s3146_s3, 768, %s45_s19, [#allocation8], %s2587_s30, %s2587_s30, %s2588_s6  }
  0x33   :  { %2579 = dma.done.wait [#allocation5], 1024  }
  0x34   :  { %2580 = vsyncadd [#allocation5], 4294966272 }
  0x35   :  { %2581 = dma.done.wait [#allocation8], 1536  }
  0x36   :  { %2582 = vsyncadd [#allocation8], 4294965760  ;;  %v2590_v0 = vmov 0.0|0.0   ;;  %vm2591_vm0 = vmmov 0   ;;  %v2592_v1 = vmov 0.0   ;;  %v68_v2 = vld [vmem:[#allocation9] sm:$0xff] }
  0x37   :  { %2248 = vmatprep.subr.bf16.mxu1 %v2590_v0  ;;  %2239 = vmatprep.subr.bf16.mxu0 %v2590_v0  ;;  %v69_v3 = vld [vmem:[#allocation9 + $0x8] sm:$0xff]  ;;  %v62_v4 = vld [vmem:[#allocation7] sm:$0xff]  ;;  %v63_v6 = vld [vmem:[#allocation7 + $0x8] sm:$0xff]  ;;  %vm77_vm1 = vcmask 130048   ;;  %vm85_vm2 = vcmask 392192   ;;  %s2593_s9 = smov 64  }
  0x38   :  { %2026 = vmatprep.mubr.msk.f32.mxu1 %vm2591_vm0, %v2592_v1  ;;  %2011 = vmatprep.mubr.msk.f32.mxu0 %vm2591_vm0, %v2592_v1  ;;  %v2685_v5 = vpack.c.bf16 %v69_v3, %v68_v2  ;;  %v70_v7 = vld [vmem:[#allocation9 + $0x10] sm:$0xff]  ;;  %v71_v8 = vld [vmem:[#allocation9 + $0x18] sm:$0xff]  ;;  %v2687_v9 = vpack.c.bf16 %v63_v6, %v62_v4  ;;  %v64_v10 = vld [vmem:[#allocation7 + $0x10] sm:$0xff]  ;;  %vm289_vm3 = vcmask 261120   ;;  %vm1842_vm4 = vcmask 523264   ;;  %s2596_s10 = smov [#allocation10]  }
  0x39   :  { %v65_v11 = vld [vmem:[#allocation7 + $0x18] sm:$0xff]  ;;  %v2690_v12 = vpack.c.bf16 %v71_v8, %v70_v7  ;;  %v72_v14 = vld [vmem:[#allocation9 + $0x20] sm:$0xff]  ;;  %v66_v16 = vld [vmem:[#allocation7 + $0x20] sm:$0xff]  ;;  %s1856_s11 = sshll.u32 %s2596_s10, 4  ;;  %s1857_s11 = int_to_ptr.vmem [resolvable:$true] %s1856_s11 }
  0x3a   :  { %2250 = vmatpush3.bf16.msra.mxu1 %v2685_v5  ;;  %2241 = vmatpush3.bf16.msra.mxu0 %v2687_v9  ;;  %v2694_v13 = vpack.c.bf16 %v65_v11, %v64_v10  ;;  %v73_v15 = vld [vmem:[#allocation9 + $0x28] sm:$0xff]  ;;  %v67_v17 = vld [vmem:[#allocation7 + $0x28] sm:$0xff]  ;;  %v2707_v21 = vld [vmem:[#allocation4] sm:$0xff]  ;;  %s2557_s12 = scalar_lea.vmem %s1857_s11, 1024  ;;  %p2562_p11 = scmp.lt.s32.totalorder %s1857_s11, %s1857_s11 }
  0x3b   :  { %2251 = vmatprep.subr.bf16.mxu1 %v2590_v0  ;;  %2242 = vmatprep.subr.bf16.mxu0 %v2590_v0  ;;  %v2698_v18 = vpack.c.bf16 %v73_v15, %v72_v14  ;;  %v2702_v19 = vld [vmem:[#allocation4 + $0x38] sm:$0xff]  ;;  %v2704_v20 = vpack.c.bf16 %v67_v17, %v66_v16  ;;  %v78_v23 = vsel %vm77_vm1, %v2707_v21, 0.0  ;;  %v2738_v24 = vld [vmem:[%s3147_s4] ss:$0 sm:$0xff]  ;;  %s2595_s4 = smov 48   ;;  %v2767_v58 = vld [vmem:[#allocation4 + $0x30] sm:$0xff]  ;;  %p2558_p10 = scmp.ne.s32.totalorder %s1857_s11, %s2557_s12 }
  0x3c   :  { %v183_v22 = vsel %vm77_vm1, %v2702_v19, 0.0  ;;  %v2743_v25 = vld [vmem:[%s3145_s2] ss:$0 sm:$0xff]  ;;  %s2594_s2 = smov 32   ;;  %v2772_v61 = vld [vmem:[#allocation4 + $0x8] sm:$0xff]  ;;  %p2563_p12 = scmp.lt.s32.totalorder %s2557_s12, %s2557_s12 }
  0x3e   :  { %2253 = vmatpush3.bf16.msra.mxu1 %v2690_v12  ;;  %2244 = vmatpush3.bf16.msra.mxu0 %v2694_v13  ;;  %p2564_p13 = por %p2563_p12, %p2562_p11 }
  0x3f   :  { %2254 = vmatprep.subr.bf16.mxu1 %v2590_v0  ;;  %2245 = vmatprep.subr.bf16.mxu0 %v2590_v0 }
  0x40   :  { %p2565_p0 = pnand %p2564_p13, %p2558_p10 }
  0x42   :  { %2256 = vmatpush3.bf16.msra.mxu1 %v2698_v18  ;;  %2247 = vmatpush3.bf16.msra.mxu0 %v2704_v20 }
  0x43   :  { %2266 = vmatprep.subr.bf16.mxu1 %v2590_v0  ;;  %2257 = vmatprep.subr.bf16.mxu0 %v2590_v0 }
  0x45   :  { %2027 = vmatmul.mubr.msk.f32.vlgmr.msra.gmra.mrb[0].mxu1 %vm85_vm2, %v183_v22  ;;  %2012 = vmatmul.mubr.msk.f32.vlgmr.msra.gmra.mrb[0].mxu0 %vm85_vm2, %v78_v23 }
  0x46   :  { %2268 = vmatpush3.bf16.msra.mxu1 %v2685_v5  ;;  %2259 = vmatpush3.bf16.msra.mxu0 %v2687_v9 }
  0x47   :  { %2269 = vmatprep.subr.bf16.mxu1 %v2590_v0  ;;  %2260 = vmatprep.subr.bf16.mxu0 %v2590_v0 }
  0x48   :  { %2056 = vmatprep.mubr.msk.f32.mxu1 %vm2591_vm0, %v2592_v1  ;;  %2041 = vmatprep.mubr.msk.f32.mxu0 %vm2591_vm0, %v2592_v1 }
  0x4a   :  { %2271 = vmatpush3.bf16.msra.mxu1 %v2690_v12  ;;  %2262 = vmatpush3.bf16.msra.mxu0 %v2694_v13 }
  0x4b   :  { %2272 = vmatprep.subr.bf16.mxu1 %v2590_v0  ;;  %2263 = vmatprep.subr.bf16.mxu0 %v2590_v0 }
  0x4e   :  { %2274 = vmatpush3.bf16.msra.mxu1 %v2698_v18  ;;  %2265 = vmatpush3.bf16.msra.mxu0 %v2704_v20 }
  0x4f   :  { %2284 = vmatprep.subr.bf16.mxu1 %v2590_v0  ;;  %2275 = vmatprep.subr.bf16.mxu0 %v2590_v0 }
 0x118   :  { %v259_v26 = vpop.f32.mrb[0].mxu1  ;;  %v155_v29 = vpop.f32.mrb[0].mxu0 }
 0x119   :  { %v260_v27 = vadd.f32 %v2738_v24, %v259_v26  ;;  %v2028_v28 = vpop.f32.mrb[1].mxu1  ;;  %v156_v30 = vadd.f32 %v2743_v25, %v155_v29  ;;  %v2013_v31 = vpop.f32.mrb[1].mxu0 }
 0x11b   :  { %2395 = vtanh.f32 %v260_v27  ;;  %v263_v34 = vmul.f32 0.5, %v260_v27  ;;  %v159_v35 = vmul.f32 0.5, %v156_v30 }
 0x11c   :  { %2397 = vtanh.f32 %v156_v30 }
 0x11d   :  { %2399 = vtanh.f32 %v263_v34 }
 0x11e   :  { %2401 = vtanh.f32 %v159_v35 }
 0x125   :  { %v2396_v32 = vpop.eup %2395 }
 0x126   :  { %270 = vrot.lane.b32.xlu0 %v2396_v32, %s2593_s9  ;;  %v2398_v33 = vpop.eup %2397 }
 0x127   :  { %v2400_v36 = vpop.eup %2399 }
 0x128   :  { %v2402_v37 = vpop.eup %2401  ;;  %v265_v38 = vmul.f32 0.5, %v2400_v36 }
 0x129   :  { %v161_v39 = vmul.f32 0.5, %v2402_v37 }
 0x12a   :  { %166 = vrot.lane.b32.xlu0 %v2398_v33, %s2593_s9  ;;  %v266_v40 = vadd.f32 0.5, %v265_v38 }
 0x12b   :  { %v162_v43 = vadd.f32 0.5, %v161_v39 }
 0x12c   :  { %v268_v46 = vmul.f32 0.0, %v266_v40 }
 0x12d   :  { %v164_v49 = vmul.f32 0.0, %v162_v43 }
 0x198   :  { %v271_v41 = vpop.permute.xlu0 %270 }
 0x199   :  { %v273_v42 = vmul.f32 %v271_v41, %v266_v40 }
 0x19b   :  { %275 = vrot.lane.b32.xlu1 %v273_v42, %s2594_s2 }
 0x19c   :  { %v167_v44 = vpop.permute.xlu0 %166 }
 0x19d   :  { %v169_v45 = vmul.f32 %v167_v44, %v162_v43  ;;  %v2817_v44 = vld [vmem:[#allocation4 + $0x28] sm:$0xff] }
 0x19f   :  { %171 = vrot.lane.b32.xlu1 %v169_v45, %s2594_s2 }
 0x20d   :  { %v276_v47 = vpop.permute.xlu1 %275 }
 0x20e   :  { %v2751_v48 = vadd.f32 %v276_v47, %v268_v46  ;;  %v2822_v47 = vld [vmem:[#allocation4 + $0x10] sm:$0xff] }
 0x210   :  { %2403 = vtanh.f32 %v2751_v48 }
 0x211   :  { %v172_v50 = vpop.permute.xlu1 %171 }
 0x212   :  { %v2754_v51 = vadd.f32 %v172_v50, %v164_v49 }
 0x214   :  { %2405 = vtanh.f32 %v2754_v51 }
 0x21a   :  { %v2404_v52 = vpop.eup %2403 }
 0x21b   :  { %281 = vrot.lane.b32.xlu0 %v2404_v52, %s2593_s9 }
 0x21e   :  { %v2406_v53 = vpop.eup %2405 }
 0x21f   :  { %177 = vrot.lane.b32.xlu1 %v2406_v53, %s2593_s9 }
 0x28d   :  { %v282_v54 = vpop.permute.xlu0 %281 }
 0x28e   :  { %v2759_v55 = vmul.f32 %v282_v54, %v266_v40 }
 0x290   :  { %400 = vrot.lane.b32.xlu0 %v2759_v55, %s2595_s4 }
 0x291   :  { %v178_v56 = vpop.permute.xlu1 %177 }
 0x292   :  { %v2763_v57 = vmul.f32 %v178_v56, %v162_v43 }
 0x294   :  { %299 = vrot.lane.b32.xlu1 %v2763_v57, %s2595_s4 }
 0x302   :  { %v401_v59 = vpop.permute.xlu0 %400 }
 0x303   :  { %v403_v60 = vsel %vm77_vm1, %v2767_v58, %v401_v59 }
 0x304   :  { %2057 = vmatmul.mubr.msk.f32.vlgmr.msra.gmra.mrb[2].mxu1 %vm85_vm2, %v403_v60 }
 0x305   :  { %2286 = vmatpush3.bf16.msra.mxu1 %v2685_v5  ;;  %2086 = vmatprep.mubr.msk.f32.mxu1 %vm2591_vm0, %v2592_v1 }
 0x306   :  { %v300_v62 = vpop.permute.xlu1 %299  ;;  %2287 = vmatprep.subr.bf16.mxu1 %v2590_v0 }
 0x307   :  { %v302_v63 = vsel %vm77_vm1, %v2772_v61, %v300_v62 }
 0x308   :  { %2042 = vmatmul.mubr.msk.f32.vlgmr.msra.gmra.mrb[2].mxu0 %vm85_vm2, %v302_v63 }
 0x309   :  { %2277 = vmatpush3.bf16.msra.mxu0 %v2687_v9  ;;  %2289 = vmatpush3.bf16.msra.mxu1 %v2690_v12 }
 0x30a   :  { %2278 = vmatprep.subr.bf16.mxu0 %v2590_v0  ;;  %2290 = vmatprep.subr.bf16.mxu1 %v2590_v0 }
 0x30b   :  { %2071 = vmatprep.mubr.msk.f32.mxu0 %vm2591_vm0, %v2592_v1 }
 0x30d   :  { %2280 = vmatpush3.bf16.msra.mxu0 %v2694_v13  ;;  %2292 = vmatpush3.bf16.msra.mxu1 %v2698_v18 }
 0x30e   :  { %2281 = vmatprep.subr.bf16.mxu0 %v2590_v0  ;;  %2302 = vmatprep.subr.bf16.mxu1 %v2590_v0 }
 0x311   :  { %2283 = vmatpush3.bf16.msra.mxu0 %v2704_v20 }
 0x312   :  { %2293 = vmatprep.subr.bf16.mxu0 %v2590_v0 }
 0x3d7   :  { %v473_v2 = vpop.f32.mrb[2].mxu1 }
 0x3d8   :  { %v474_v3 = vadd.f32 %v2738_v24, %v473_v2  ;;  %v2058_v4 = vpop.f32.mrb[3].mxu1 }
 0x3da   :  { %2407 = vtanh.f32 %v474_v3  ;;  %v477_v14 = vmul.f32 0.5, %v474_v3 }
 0x3db   :  { %v372_v6 = vpop.f32.mrb[2].mxu0 }
 0x3dc   :  { %v373_v7 = vadd.f32 %v2743_v25, %v372_v6  ;;  %v2043_v8 = vpop.f32.mrb[3].mxu0 }
 0x3de   :  { %2409 = vtanh.f32 %v373_v7  ;;  %v376_v15 = vmul.f32 0.5, %v373_v7 }
 0x3df   :  { %2411 = vtanh.f32 %v477_v14 }
 0x3e0   :  { %2413 = vtanh.f32 %v376_v15 }
 0x3e4   :  { %v2408_v10 = vpop.eup %2407 }
 0x3e5   :  { %484 = vrot.lane.b32.xlu0 %v2408_v10, %s2593_s9 }
 0x3e8   :  { %v2410_v11 = vpop.eup %2409 }
 0x3e9   :  { %383 = vrot.lane.b32.xlu1 %v2410_v11, %s2593_s9  ;;  %v2412_v16 = vpop.eup %2411 }
 0x3ea   :  { %v479_v17 = vmul.f32 0.5, %v2412_v16  ;;  %v2414_v22 = vpop.eup %2413 }
 0x3eb   :  { %v378_v26 = vmul.f32 0.5, %v2414_v22 }
 0x3ec   :  { %v480_v23 = vadd.f32 0.5, %v479_v17 }
 0x3ed   :  { %v379_v29 = vadd.f32 0.5, %v378_v26 }
 0x3ee   :  { %v482_v32 = vmul.f32 %v480_v23, %v2751_v48 }
 0x3ef   :  { %v381_v35 = vmul.f32 %v379_v29, %v2754_v51 }
 0x457   :  { %v485_v27 = vpop.permute.xlu0 %484 }
 0x458   :  { %v487_v28 = vmul.f32 %v485_v27, %v480_v23 }
 0x45a   :  { %489 = vrot.lane.b32.xlu0 %v487_v28, %s2594_s2 }
 0x45b   :  { %v384_v30 = vpop.permute.xlu1 %383 }
 0x45c   :  { %v386_v31 = vmul.f32 %v384_v30, %v379_v29 }
 0x45e   :  { %388 = vrot.lane.b32.xlu1 %v386_v31, %s2594_s2 }
 0x4cc   :  { %v490_v33 = vpop.permute.xlu0 %489 }
 0x4cd   :  { %v2800_v34 = vadd.f32 %v490_v33, %v482_v32 }
 0x4cf   :  { %2415 = vtanh.f32 %v2800_v34 }
 0x4d0   :  { %v389_v36 = vpop.permute.xlu1 %388 }
 0x4d1   :  { %v2804_v37 = vadd.f32 %v389_v36, %v381_v35 }
 0x4d3   :  { %2417 = vtanh.f32 %v2804_v37 }
 0x4d9   :  { %v2416_v38 = vpop.eup %2415 }
 0x4da   :  { %495 = vrot.lane.b32.xlu0 %v2416_v38, %s2593_s9 }
 0x4dd   :  { %v2418_v39 = vpop.eup %2417 }
 0x4de   :  { %394 = vrot.lane.b32.xlu1 %v2418_v39, %s2593_s9 }
 0x54c   :  { %v496_v40 = vpop.permute.xlu0 %495 }
 0x54d   :  { %v2809_v41 = vmul.f32 %v496_v40, %v480_v23 }
 0x54f   :  { %614 = vrot.lane.b32.xlu0 %v2809_v41, %s2595_s4 }
 0x550   :  { %v395_v42 = vpop.permute.xlu1 %394 }
 0x551   :  { %v2813_v43 = vmul.f32 %v395_v42, %v379_v29 }
 0x553   :  { %513 = vrot.lane.b32.xlu1 %v2813_v43, %s2595_s4 }
 0x5c1   :  { %v615_v45 = vpop.permute.xlu0 %614 }
 0x5c2   :  { %v617_v46 = vsel %vm77_vm1, %v2817_v44, %v615_v45 }
 0x5c3   :  { %2087 = vmatmul.mubr.msk.f32.vlgmr.msra.gmra.mrb[4].mxu1 %vm85_vm2, %v617_v46 }
 0x5c4   :  { %2304 = vmatpush3.bf16.msra.mxu1 %v2685_v5  ;;  %2116 = vmatprep.mubr.msk.f32.mxu1 %vm2591_vm0, %v2592_v1 }
 0x5c5   :  { %v514_v48 = vpop.permute.xlu1 %513  ;;  %2305 = vmatprep.subr.bf16.mxu1 %v2590_v0 }
 0x5c6   :  { %v516_v49 = vsel %vm77_vm1, %v2822_v47, %v514_v48 }
 0x5c7   :  { %2072 = vmatmul.mubr.msk.f32.vlgmr.msra.gmra.mrb[4].mxu0 %vm85_vm2, %v516_v49 }
 0x5c8   :  { %2295 = vmatpush3.bf16.msra.mxu0 %v2687_v9  ;;  %2307 = vmatpush3.bf16.msra.mxu1 %v2690_v12 }
 0x5c9   :  { %2296 = vmatprep.subr.bf16.mxu0 %v2590_v0  ;;  %2308 = vmatprep.subr.bf16.mxu1 %v2590_v0 }
 0x5ca   :  { %2101 = vmatprep.mubr.msk.f32.mxu0 %vm2591_vm0, %v2592_v1 }
 0x5cc   :  { %2298 = vmatpush3.bf16.msra.mxu0 %v2694_v13  ;;  %2310 = vmatpush3.bf16.msra.mxu1 %v2698_v18 }
 0x5cd   :  { %2299 = vmatprep.subr.bf16.mxu0 %v2590_v0  ;;  %2320 = vmatprep.subr.bf16.mxu1 %v2590_v0 }
 0x5d0   :  { %2301 = vmatpush3.bf16.msra.mxu0 %v2704_v20 }
 0x5d1   :  { %2311 = vmatprep.subr.bf16.mxu0 %v2590_v0 }
 0x696   :  { %v687_v50 = vpop.f32.mrb[4].mxu1 }
 0x697   :  { %v688_v51 = vadd.f32 %v2738_v24, %v687_v50  ;;  %v2088_v52 = vpop.f32.mrb[5].mxu1 }
 0x699   :  { %2419 = vtanh.f32 %v688_v51  ;;  %v691_v62 = vmul.f32 0.5, %v688_v51 }
 0x69a   :  { %v586_v53 = vpop.f32.mrb[4].mxu0 }
 0x69b   :  { %v587_v54 = vadd.f32 %v2743_v25, %v586_v53  ;;  %v2073_v56 = vpop.f32.mrb[5].mxu0 }
 0x69d   :  { %2421 = vtanh.f32 %v587_v54  ;;  %v590_v63 = vmul.f32 0.5, %v587_v54 }
 0x69e   :  { %2423 = vtanh.f32 %v691_v62 }
 0x69f   :  { %2425 = vtanh.f32 %v590_v63 }
 0x6a3   :  { %v2420_v59 = vpop.eup %2419 }
 0x6a4   :  { %698 = vrot.lane.b32.xlu0 %v2420_v59, %s2593_s9 }
 0x6a7   :  { %v2422_v60 = vpop.eup %2421 }
 0x6a8   :  { %597 = vrot.lane.b32.xlu1 %v2422_v60, %s2593_s9  ;;  %v2424_v2 = vpop.eup %2423 }
 0x6a9   :  { %v693_v3 = vmul.f32 0.5, %v2424_v2  ;;  %v2426_v4 = vpop.eup %2425 }
 0x6aa   :  { %v592_v7 = vmul.f32 0.5, %v2426_v4 }
 0x6ab   :  { %v694_v6 = vadd.f32 0.5, %v693_v3 }
 0x6ac   :  { %v593_v11 = vadd.f32 0.5, %v592_v7 }
 0x6ad   :  { %v696_v16 = vmul.f32 %v694_v6, %v2800_v34  ;;  %v2867_v34 = vld [vmem:[#allocation4 + $0x20] sm:$0xff] }
 0x6ae   :  { %v595_v23 = vmul.f32 %v593_v11, %v2804_v37  ;;  %v2872_v37 = vld [vmem:[#allocation4 + $0x18] sm:$0xff] }
 0x716   :  { %v699_v8 = vpop.permute.xlu0 %698 }
 0x717   :  { %v701_v10 = vmul.f32 %v699_v8, %v694_v6 }
 0x719   :  { %703 = vrot.lane.b32.xlu0 %v701_v10, %s2594_s2 }
 0x71a   :  { %v598_v14 = vpop.permute.xlu1 %597 }
 0x71b   :  { %v600_v15 = vmul.f32 %v598_v14, %v593_v11 }
 0x71d   :  { %602 = vrot.lane.b32.xlu1 %v600_v15, %s2594_s2 }
 0x78b   :  { %v704_v17 = vpop.permute.xlu0 %703 }
 0x78c   :  { %v2850_v22 = vadd.f32 %v704_v17, %v696_v16 }
 0x78e   :  { %2427 = vtanh.f32 %v2850_v22 }
 0x78f   :  { %v603_v26 = vpop.permute.xlu1 %602 }
 0x790   :  { %v2854_v27 = vadd.f32 %v603_v26, %v595_v23 }
 0x792   :  { %2429 = vtanh.f32 %v2854_v27 }
 0x798   :  { %v2428_v28 = vpop.eup %2427 }
 0x799   :  { %709 = vrot.lane.b32.xlu0 %v2428_v28, %s2593_s9 }
 0x79c   :  { %v2430_v29 = vpop.eup %2429 }
 0x79d   :  { %608 = vrot.lane.b32.xlu1 %v2430_v29, %s2593_s9 }
 0x80b   :  { %v710_v30 = vpop.permute.xlu0 %709 }
 0x80c   :  { %v2859_v31 = vmul.f32 %v710_v30, %v694_v6 }
 0x80e   :  { %828 = vrot.lane.b32.xlu0 %v2859_v31, %s2595_s4 }
 0x80f   :  { %v609_v32 = vpop.permute.xlu1 %608 }
 0x810   :  { %v2863_v33 = vmul.f32 %v609_v32, %v593_v11 }
 0x812   :  { %727 = vrot.lane.b32.xlu1 %v2863_v33, %s2595_s4 }
 0x880   :  { %v829_v35 = vpop.permute.xlu0 %828 }
 0x881   :  { %v831_v36 = vsel %vm77_vm1, %v2867_v34, %v829_v35 }
 0x882   :  { %2117 = vmatmul.mubr.msk.f32.vlgmr.msra.gmra.mrb[6].mxu1 %vm85_vm2, %v831_v36 }
 0x883   :  { %2322 = vmatpush3.bf16.msra.mxu1 %v2685_v5  ;;  %2146 = vmatprep.mubr.msk.f32.mxu1 %vm2591_vm0, %v2592_v1 }
 0x884   :  { %v728_v38 = vpop.permute.xlu1 %727  ;;  %2323 = vmatprep.subr.bf16.mxu1 %v2590_v0 }
 0x885   :  { %v730_v39 = vsel %vm77_vm1, %v2872_v37, %v728_v38 }
 0x886   :  { %2102 = vmatmul.mubr.msk.f32.vlgmr.msra.gmra.mrb[6].mxu0 %vm85_vm2, %v730_v39 }
 0x887   :  { %2313 = vmatpush3.bf16.msra.mxu0 %v2687_v9  ;;  %2325 = vmatpush3.bf16.msra.mxu1 %v2690_v12 }
 0x888   :  { %2314 = vmatprep.subr.bf16.mxu0 %v2590_v0  ;;  %2326 = vmatprep.subr.bf16.mxu1 %v2590_v0 }
 0x889   :  { %2131 = vmatprep.mubr.msk.f32.mxu0 %vm2591_vm0, %v2592_v1 }
 0x88b   :  { %2316 = vmatpush3.bf16.msra.mxu0 %v2694_v13  ;;  %2328 = vmatpush3.bf16.msra.mxu1 %v2698_v18 }
 0x88c   :  { %2317 = vmatprep.subr.bf16.mxu0 %v2590_v0  ;;  %2338 = vmatprep.subr.bf16.mxu1 %v2590_v0 }
 0x88f   :  { %2319 = vmatpush3.bf16.msra.mxu0 %v2704_v20 }
 0x890   :  { %2329 = vmatprep.subr.bf16.mxu0 %v2590_v0 }
 0x955   :  { %v901_v40 = vpop.f32.mrb[6].mxu1 }
 0x956   :  { %v902_v42 = vadd.f32 %v2738_v24, %v901_v40  ;;  %v2118_v45 = vpop.f32.mrb[7].mxu1 }
 0x958   :  { %2431 = vtanh.f32 %v902_v42  ;;  %v905_v52 = vmul.f32 0.5, %v902_v42 }
 0x959   :  { %v800_v46 = vpop.f32.mrb[6].mxu0 }
 0x95a   :  { %v801_v48 = vadd.f32 %v2743_v25, %v800_v46  ;;  %v2103_v49 = vpop.f32.mrb[7].mxu0 }
 0x95c   :  { %2433 = vtanh.f32 %v801_v48  ;;  %v804_v53 = vmul.f32 0.5, %v801_v48 }
 0x95d   :  { %2435 = vtanh.f32 %v905_v52 }
 0x95e   :  { %2437 = vtanh.f32 %v804_v53 }
 0x962   :  { %v2432_v50 = vpop.eup %2431 }
 0x963   :  { %912 = vrot.lane.b32.xlu0 %v2432_v50, %s2593_s9 }
 0x966   :  { %v2434_v51 = vpop.eup %2433 }
 0x967   :  { %811 = vrot.lane.b32.xlu1 %v2434_v51, %s2593_s9  ;;  %v2436_v54 = vpop.eup %2435 }
 0x968   :  { %v907_v56 = vmul.f32 0.5, %v2436_v54  ;;  %v2438_v59 = vpop.eup %2437 }
 0x969   :  { %v806_v62 = vmul.f32 0.5, %v2438_v59 }
 0x96a   :  { %v908_v60 = vadd.f32 0.5, %v907_v56 }
 0x96b   :  { %v807_v3 = vadd.f32 0.5, %v806_v62 }
 0x96c   :  { %v910_v7 = vmul.f32 %v908_v60, %v2850_v22 }
 0x96d   :  { %v809_v11 = vmul.f32 %v807_v3, %v2854_v27 }
 0x9d5   :  { %v913_v63 = vpop.permute.xlu0 %912 }
 0x9d6   :  { %v915_v2 = vmul.f32 %v913_v63, %v908_v60 }
 0x9d8   :  { %917 = vrot.lane.b32.xlu0 %v915_v2, %s2594_s2 }
 0x9d9   :  { %v812_v4 = vpop.permute.xlu1 %811 }
 0x9da   :  { %v814_v6 = vmul.f32 %v812_v4, %v807_v3 }
 0x9dc   :  { %816 = vrot.lane.b32.xlu1 %v814_v6, %s2594_s2 }
 0xa4a   :  { %v918_v8 = vpop.permute.xlu0 %917 }
 0xa4b   :  { %v2900_v10 = vadd.f32 %v918_v8, %v910_v7 }
 0xa4d   :  { %2439 = vtanh.f32 %v2900_v10 }
 0xa4e   :  { %v817_v14 = vpop.permute.xlu1 %816 }
 0xa4f   :  { %v2904_v15 = vadd.f32 %v817_v14, %v809_v11 }
 0xa51   :  { %2441 = vtanh.f32 %v2904_v15 }
 0xa57   :  { %v2440_v16 = vpop.eup %2439 }
 0xa58   :  { %923 = vrot.lane.b32.xlu0 %v2440_v16, %s2593_s9 }
 0xa5b   :  { %v2442_v17 = vpop.eup %2441 }
 0xa5c   :  { %822 = vrot.lane.b32.xlu1 %v2442_v17, %s2593_s9 }
 0xaca   :  { %v924_v23 = vpop.permute.xlu0 %923 }
 0xacb   :  { %v2909_v22 = vmul.f32 %v924_v23, %v908_v60 }
 0xacd   :  { %1040 = vrot.lane.b32.xlu0 %v2909_v22, %s2595_s4 }
 0xace   :  { %v823_v26 = vpop.permute.xlu1 %822 }
 0xacf   :  { %v2913_v28 = vmul.f32 %v823_v26, %v807_v3 }
 0xad1   :  { %940 = vrot.lane.b32.xlu1 %v2913_v28, %s2595_s4 }
 0xb3f   :  { %v1041_v27 = vpop.permute.xlu0 %1040 }
 0xb40   :  { %v1043_v29 = vsel %vm77_vm1, %v2872_v37, %v1041_v27 }
 0xb41   :  { %2147 = vmatmul.mubr.msk.f32.vlgmr.msra.gmra.mrb[8].mxu1 %vm85_vm2, %v1043_v29 }
 0xb42   :  { %2340 = vmatpush3.bf16.msra.mxu1 %v2685_v5  ;;  %2176 = vmatprep.mubr.msk.f32.mxu1 %vm2591_vm0, %v2592_v1 }
 0xb43   :  { %v941_v30 = vpop.permute.xlu1 %940  ;;  %2341 = vmatprep.subr.bf16.mxu1 %v2590_v0 }
 0xb44   :  { %v943_v32 = vsel %vm77_vm1, %v2867_v34, %v941_v30 }
 0xb45   :  { %2132 = vmatmul.mubr.msk.f32.vlgmr.msra.gmra.mrb[8].mxu0 %vm85_vm2, %v943_v32 }
 0xb46   :  { %2331 = vmatpush3.bf16.msra.mxu0 %v2687_v9  ;;  %2343 = vmatpush3.bf16.msra.mxu1 %v2690_v12 }
 0xb47   :  { %2332 = vmatprep.subr.bf16.mxu0 %v2590_v0  ;;  %2344 = vmatprep.subr.bf16.mxu1 %v2590_v0 }
 0xb48   :  { %2161 = vmatprep.mubr.msk.f32.mxu0 %vm2591_vm0, %v2592_v1 }
 0xb4a   :  { %2334 = vmatpush3.bf16.msra.mxu0 %v2694_v13  ;;  %2346 = vmatpush3.bf16.msra.mxu1 %v2698_v18 }
 0xb4b   :  { %2335 = vmatprep.subr.bf16.mxu0 %v2590_v0  ;;  %2356 = vmatprep.subr.bf16.mxu1 %v2590_v0 }
 0xb4e   :  { %2337 = vmatpush3.bf16.msra.mxu0 %v2704_v20 }
 0xb4f   :  { %2347 = vmatprep.subr.bf16.mxu0 %v2590_v0 }
 0xc14   :  { %v1113_v34 = vpop.f32.mrb[8].mxu1 }
 0xc15   :  { %v1114_v35 = vadd.f32 %v2738_v24, %v1113_v34  ;;  %v2148_v36 = vpop.f32.mrb[9].mxu1 }
 0xc17   :  { %2443 = vtanh.f32 %v1114_v35  ;;  %v1117_v45 = vmul.f32 0.5, %v1114_v35 }
 0xc18   :  { %v1013_v37 = vpop.f32.mrb[8].mxu0 }
 0xc19   :  { %v1014_v38 = vadd.f32 %v2743_v25, %v1013_v37  ;;  %v2133_v39 = vpop.f32.mrb[9].mxu0 }
 0xc1b   :  { %2445 = vtanh.f32 %v1014_v38  ;;  %v1017_v46 = vmul.f32 0.5, %v1014_v38 }
 0xc1c   :  { %2447 = vtanh.f32 %v1117_v45 }
 0xc1d   :  { %2449 = vtanh.f32 %v1017_v46 }
 0xc21   :  { %v2444_v40 = vpop.eup %2443 }
 0xc22   :  { %1124 = vrot.lane.b32.xlu0 %v2444_v40, %s2593_s9 }
 0xc25   :  { %v2446_v42 = vpop.eup %2445 }
 0xc26   :  { %1024 = vrot.lane.b32.xlu1 %v2446_v42, %s2593_s9  ;;  %v2448_v48 = vpop.eup %2447 }
 0xc27   :  { %v1119_v49 = vmul.f32 0.5, %v2448_v48  ;;  %v2450_v50 = vpop.eup %2449 }
 0xc28   :  { %v1019_v52 = vmul.f32 0.5, %v2450_v50 }
 0xc29   :  { %v1120_v51 = vadd.f32 0.5, %v1119_v49 }
 0xc2a   :  { %v1020_v56 = vadd.f32 0.5, %v1019_v52 }
 0xc2b   :  { %v1122_v62 = vmul.f32 %v1120_v51, %v2900_v10 }
 0xc2c   :  { %v1022_v3 = vmul.f32 %v1020_v56, %v2904_v15 }
 0xc94   :  { %v1125_v53 = vpop.permute.xlu0 %1124 }
 0xc95   :  { %v1127_v54 = vmul.f32 %v1125_v53, %v1120_v51 }
 0xc97   :  { %1129 = vrot.lane.b32.xlu0 %v1127_v54, %s2594_s2 }
 0xc98   :  { %v1025_v59 = vpop.permute.xlu1 %1024 }
 0xc99   :  { %v1027_v60 = vmul.f32 %v1025_v59, %v1020_v56 }
 0xc9b   :  { %1029 = vrot.lane.b32.xlu1 %v1027_v60, %s2594_s2 }
 0xd09   :  { %v1130_v63 = vpop.permute.xlu0 %1129 }
 0xd0a   :  { %v2946_v2 = vadd.f32 %v1130_v63, %v1122_v62 }
 0xd0c   :  { %2451 = vtanh.f32 %v2946_v2 }
 0xd0d   :  { %v1030_v4 = vpop.permute.xlu1 %1029 }
 0xd0e   :  { %v2950_v6 = vadd.f32 %v1030_v4, %v1022_v3 }
 0xd10   :  { %2453 = vtanh.f32 %v2950_v6 }
 0xd16   :  { %v2452_v7 = vpop.eup %2451 }
 0xd17   :  { %1135 = vrot.lane.b32.xlu0 %v2452_v7, %s2593_s9 }
 0xd1a   :  { %v2454_v8 = vpop.eup %2453 }
 0xd1b   :  { %1035 = vrot.lane.b32.xlu1 %v2454_v8, %s2593_s9 }
 0xd89   :  { %v1136_v11 = vpop.permute.xlu0 %1135 }
 0xd8a   :  { %v2955_v10 = vmul.f32 %v1136_v11, %v1120_v51 }
 0xd8c   :  { %1252 = vrot.lane.b32.xlu0 %v2955_v10, %s2595_s4 }
 0xd8d   :  { %v1036_v14 = vpop.permute.xlu1 %1035 }
 0xd8e   :  { %v2959_v16 = vmul.f32 %v1036_v14, %v1020_v56 }
 0xd90   :  { %1152 = vrot.lane.b32.xlu1 %v2959_v16, %s2595_s4 }
 0xdfe   :  { %v1253_v15 = vpop.permute.xlu0 %1252 }
 0xdff   :  { %v1255_v17 = vsel %vm77_vm1, %v2822_v47, %v1253_v15 }
 0xe00   :  { %2177 = vmatmul.mubr.msk.f32.vlgmr.msra.gmra.mrb[10].mxu1 %vm85_vm2, %v1255_v17 }
 0xe01   :  { %2358 = vmatpush3.bf16.msra.mxu1 %v2685_v5  ;;  %2206 = vmatprep.mubr.msk.f32.mxu1 %vm2591_vm0, %v2592_v1 }
 0xe02   :  { %v1153_v23 = vpop.permute.xlu1 %1152  ;;  %2359 = vmatprep.subr.bf16.mxu1 %v2590_v0 }
 0xe03   :  { %v1155_v26 = vsel %vm77_vm1, %v2817_v44, %v1153_v23 }
 0xe04   :  { %2162 = vmatmul.mubr.msk.f32.vlgmr.msra.gmra.mrb[10].mxu0 %vm85_vm2, %v1155_v26 }
 0xe05   :  { %2349 = vmatpush3.bf16.msra.mxu0 %v2687_v9  ;;  %2361 = vmatpush3.bf16.msra.mxu1 %v2690_v12 }
 0xe06   :  { %2350 = vmatprep.subr.bf16.mxu0 %v2590_v0  ;;  %2362 = vmatprep.subr.bf16.mxu1 %v2590_v0 }
 0xe07   :  { %2191 = vmatprep.mubr.msk.f32.mxu0 %vm2591_vm0, %v2592_v1 }
 0xe09   :  { %2352 = vmatpush3.bf16.msra.mxu0 %v2694_v13  ;;  %2364 = vmatpush3.bf16.msra.mxu1 %v2698_v18 }
 0xe0a   :  { %2353 = vmatprep.subr.bf16.mxu0 %v2590_v0  ;;  %2374 = vmatprep.subr.bf16.mxu1 %v2590_v0 }
 0xe0d   :  { %2355 = vmatpush3.bf16.msra.mxu0 %v2704_v20 }
 0xe0e   :  { %2365 = vmatprep.subr.bf16.mxu0 %v2590_v0 }
 0xed3   :  { %v1325_v44 = vpop.f32.mrb[10].mxu1 }
 0xed4   :  { %v1326_v47 = vadd.f32 %v2738_v24, %v1325_v44  ;;  %v2178_v27 = vpop.f32.mrb[11].mxu1 }
 0xed6   :  { %2455 = vtanh.f32 %v1326_v47  ;;  %v1329_v36 = vmul.f32 0.5, %v1326_v47 }
 0xed7   :  { %v1225_v29 = vpop.f32.mrb[10].mxu0 }
 0xed8   :  { %v1226_v30 = vadd.f32 %v2743_v25, %v1225_v29  ;;  %v2163_v32 = vpop.f32.mrb[11].mxu0 }
 0xeda   :  { %2457 = vtanh.f32 %v1226_v30  ;;  %v1229_v37 = vmul.f32 0.5, %v1226_v30 }
 0xedb   :  { %2459 = vtanh.f32 %v1329_v36 }
 0xedc   :  { %2461 = vtanh.f32 %v1229_v37 }
 0xee0   :  { %v2456_v34 = vpop.eup %2455 }
 0xee1   :  { %1336 = vrot.lane.b32.xlu0 %v2456_v34, %s2593_s9 }
 0xee4   :  { %v2458_v35 = vpop.eup %2457 }
 0xee5   :  { %1236 = vrot.lane.b32.xlu1 %v2458_v35, %s2593_s9  ;;  %v2460_v38 = vpop.eup %2459 }
 0xee6   :  { %v1331_v39 = vmul.f32 0.5, %v2460_v38  ;;  %v2462_v40 = vpop.eup %2461 }
 0xee7   :  { %v1231_v45 = vmul.f32 0.5, %v2462_v40 }
 0xee8   :  { %v1332_v42 = vadd.f32 0.5, %v1331_v39 }
 0xee9   :  { %v1232_v49 = vadd.f32 0.5, %v1231_v45 }
 0xeea   :  { %v1334_v52 = vmul.f32 %v1332_v42, %v2946_v2 }
 0xeeb   :  { %v1234_v56 = vmul.f32 %v1232_v49, %v2950_v6 }
 0xf53   :  { %v1337_v46 = vpop.permute.xlu0 %1336 }
 0xf54   :  { %v1339_v48 = vmul.f32 %v1337_v46, %v1332_v42 }
 0xf56   :  { %1341 = vrot.lane.b32.xlu0 %v1339_v48, %s2594_s2 }
 0xf57   :  { %v1237_v50 = vpop.permute.xlu1 %1236 }
 0xf58   :  { %v1239_v51 = vmul.f32 %v1237_v50, %v1232_v49 }
 0xf5a   :  { %1241 = vrot.lane.b32.xlu1 %v1239_v51, %s2594_s2 }
 0xfc8   :  { %v1342_v53 = vpop.permute.xlu0 %1341 }
 0xfc9   :  { %v1344_v54 = vadd.f32 %v1342_v53, %v1334_v52 }
 0xfcb   :  { %2463 = vtanh.f32 %v1344_v54 }
 0xfcc   :  { %v1242_v59 = vpop.permute.xlu1 %1241 }
 0xfcd   :  { %v1244_v60 = vadd.f32 %v1242_v59, %v1234_v56 }
 0xfcf   :  { %2465 = vtanh.f32 %v1244_v60 }
 0xfd5   :  { %v2464_v62 = vpop.eup %2463 }
 0xfd6   :  { %1347 = vrot.lane.b32.xlu0 %v2464_v62, %s2593_s9 }
 0xfd9   :  { %v2466_v63 = vpop.eup %2465 }
 0xfda   :  { %1247 = vrot.lane.b32.xlu1 %v2466_v63, %s2593_s9 }
0x1048   :  { %v1348_v3 = vpop.permute.xlu0 %1347 }
0x1049   :  { %v2995_v4 = vmul.f32 %v1348_v3, %v1332_v42 }
0x104b   :  { %1464 = vrot.lane.b32.xlu0 %v2995_v4, %s2595_s4 }
0x104c   :  { %v1248_v2 = vpop.permute.xlu1 %1247 }
0x104d   :  { %v2999_v7 = vmul.f32 %v1248_v2, %v1232_v49 }
0x104f   :  { %1364 = vrot.lane.b32.xlu1 %v2999_v7, %s2595_s4 }
0x10bd   :  { %v1465_v6 = vpop.permute.xlu0 %1464 }
0x10be   :  { %v1467_v8 = vsel %vm77_vm1, %v2772_v61, %v1465_v6 }
0x10bf   :  { %2207 = vmatmul.mubr.msk.f32.vlgmr.msra.gmra.mrb[12].mxu1 %vm85_vm2, %v1467_v8 }
0x10c0   :  { %2376 = vmatpush3.bf16.msra.mxu1 %v2685_v5  ;;  %2236 = vmatprep.mubr.msk.f32.mxu1 %vm2591_vm0, %v2592_v1 }
0x10c1   :  { %v1365_v11 = vpop.permute.xlu1 %1364  ;;  %2377 = vmatprep.subr.bf16.mxu1 %v2590_v0 }
0x10c2   :  { %v1367_v14 = vsel %vm77_vm1, %v2767_v58, %v1365_v11 }
0x10c3   :  { %2192 = vmatmul.mubr.msk.f32.vlgmr.msra.gmra.mrb[12].mxu0 %vm85_vm2, %v1367_v14 }
0x10c4   :  { %2367 = vmatpush3.bf16.msra.mxu0 %v2687_v9  ;;  %2379 = vmatpush3.bf16.msra.mxu1 %v2690_v12 }
0x10c5   :  { %2368 = vmatprep.subr.bf16.mxu0 %v2590_v0  ;;  %2380 = vmatprep.subr.bf16.mxu1 %v2590_v0 }
0x10c6   :  { %2221 = vmatprep.mubr.msk.f32.mxu0 %vm2591_vm0, %v2592_v1 }
0x10c8   :  { %2370 = vmatpush3.bf16.msra.mxu0 %v2694_v13  ;;  %2382 = vmatpush3.bf16.msra.mxu1 %v2698_v18 }
0x10c9   :  { %2371 = vmatprep.subr.bf16.mxu0 %v2590_v0 }
0x10cc   :  { %2373 = vmatpush3.bf16.msra.mxu0 %v2704_v20 }
0x1192   :  { %v1537_v5 = vpop.f32.mrb[12].mxu1 }
0x1193   :  { %v1538_v9 = vadd.f32 %v2738_v24, %v1537_v5  ;;  %v2208_v58 = vpop.f32.mrb[13].mxu1 }
0x1195   :  { %2467 = vtanh.f32 %v1538_v9  ;;  %v1541_v13 = vmul.f32 0.5, %v1538_v9 }
0x1196   :  { %v1437_v12 = vpop.f32.mrb[12].mxu0 }
0x1197   :  { %v1438_v61 = vadd.f32 %v2743_v25, %v1437_v12  ;;  %v2193_v15 = vpop.f32.mrb[13].mxu0 }
0x1199   :  { %2469 = vtanh.f32 %v1438_v61  ;;  %v1441_v0 = vmul.f32 0.5, %v1438_v61 }
0x119a   :  { %2471 = vtanh.f32 %v1541_v13 }
0x119b   :  { %2473 = vtanh.f32 %v1441_v0 }
0x119f   :  { %v2468_v17 = vpop.eup %2467 }
0x11a0   :  { %1548 = vrot.lane.b32.xlu0 %v2468_v17, %s2593_s9 }
0x11a3   :  { %v2470_v1 = vpop.eup %2469 }
0x11a4   :  { %1448 = vrot.lane.b32.xlu1 %v2470_v1, %s2593_s9  ;;  %v2472_v18 = vpop.eup %2471 }
0x11a5   :  { %v1543_v20 = vmul.f32 0.5, %v2472_v18  ;;  %v2474_v23 = vpop.eup %2473 }
0x11a6   :  { %v1443_v44 = vmul.f32 0.5, %v2474_v23 }
0x11a7   :  { %v1544_v26 = vadd.f32 0.5, %v1543_v20 }
0x11a8   :  { %v1444_v29 = vadd.f32 0.5, %v1443_v44 }
0x11a9   :  { %v1546_v34 = vmul.f32 %v1544_v26, %v1344_v54 }
0x11aa   :  { %v1446_v37 = vmul.f32 %v1444_v29, %v1244_v60 }
0x1212   :  { %v1549_v47 = vpop.permute.xlu0 %1548 }
0x1213   :  { %v1551_v27 = vmul.f32 %v1549_v47, %v1544_v26 }
0x1215   :  { %1553 = vrot.lane.b32.xlu0 %v1551_v27, %s2594_s2 }
0x1216   :  { %v1449_v30 = vpop.permute.xlu1 %1448 }
0x1217   :  { %v1451_v32 = vmul.f32 %v1449_v30, %v1444_v29 }
0x1219   :  { %1453 = vrot.lane.b32.xlu1 %v1451_v32, %s2594_s2 }
0x1287   :  { %v1554_v35 = vpop.permute.xlu0 %1553 }
0x1288   :  { %v1556_v36 = vadd.f32 %v1554_v35, %v1546_v34 }
0x128a   :  { %2475 = vtanh.f32 %v1556_v36 }
0x128b   :  { %v1454_v38 = vpop.permute.xlu1 %1453 }
0x128c   :  { %v1456_v39 = vadd.f32 %v1454_v38, %v1446_v37 }
0x128e   :  { %2477 = vtanh.f32 %v1456_v39 }
0x1294   :  { %v2476_v40 = vpop.eup %2475 }
0x1295   :  { %1559 = vrot.lane.b32.xlu0 %v2476_v40, %s2593_s9 }
0x1298   :  { %v2478_v42 = vpop.eup %2477 }
0x1299   :  { %1459 = vrot.lane.b32.xlu1 %v2478_v42, %s2593_s9 }
0x1307   :  { %v1560_v45 = vpop.permute.xlu0 %1559 }
0x1308   :  { %v3031_v46 = vmul.f32 %v1560_v45, %v1544_v26 }
0x130a   :  { %1676 = vrot.lane.b32.xlu0 %v3031_v46, %s2595_s4 }
0x130b   :  { %v1460_v48 = vpop.permute.xlu1 %1459 }
0x130c   :  { %v3035_v49 = vmul.f32 %v1460_v48, %v1444_v29 }
0x130e   :  { %1576 = vrot.lane.b32.xlu1 %v3035_v49, %s2595_s4 }
0x137c   :  { %v1677_v50 = vpop.permute.xlu0 %1676 }
0x137d   :  { %v1679_v51 = vsel %vm77_vm1, %v2707_v21, %v1677_v50 }
0x137e   :  { %2237 = vmatmul.mubr.msk.f32.vlgmr.msra.gmra.mrb[14].mxu1 %vm85_vm2, %v1679_v51 }
0x1380   :  { %v1577_v52 = vpop.permute.xlu1 %1576 }
0x1381   :  { %v1579_v53 = vsel %vm77_vm1, %v2702_v19, %v1577_v52 }
0x1382   :  { %2222 = vmatmul.mubr.msk.f32.vlgmr.msra.gmra.mrb[14].mxu0 %vm85_vm2, %v1579_v53 }
0x1451   :  { %v1749_v54 = vpop.f32.mrb[14].mxu1 }
0x1452   :  { %v1750_v56 = vadd.f32 %v2738_v24, %v1749_v54  ;;  %v2238_v59 = vpop.f32.mrb[15].mxu1 }
0x1454   :  { %2479 = vtanh.f32 %v1750_v56  ;;  %v1753_v2 = vmul.f32 0.5, %v1750_v56 }
0x1455   :  { %v1649_v60 = vpop.f32.mrb[14].mxu0 }
0x1456   :  { %v1650_v62 = vadd.f32 %v2743_v25, %v1649_v60  ;;  %v2223_v63 = vpop.f32.mrb[15].mxu0 }
0x1458   :  { %2481 = vtanh.f32 %v1650_v62  ;;  %v1653_v19 = vmul.f32 0.5, %v1650_v62 }
0x1459   :  { %2483 = vtanh.f32 %v1753_v2 }
0x145a   :  { %2485 = vtanh.f32 %v1653_v19 }
0x145e   :  { %v2480_v3 = vpop.eup %2479 }
0x145f   :  { %1760 = vrot.lane.b32.xlu0 %v2480_v3, %s2593_s9 }
0x1462   :  { %v2482_v21 = vpop.eup %2481 }
0x1463   :  { %1660 = vrot.lane.b32.xlu1 %v2482_v21, %s2593_s9  ;;  %v2484_v6 = vpop.eup %2483 }
0x1464   :  { %v1755_v8 = vmul.f32 0.5, %v2484_v6  ;;  %v2486_v24 = vpop.eup %2485 }
0x1465   :  { %v1655_v14 = vmul.f32 0.5, %v2486_v24 }
0x1466   :  { %v1756_v11 = vadd.f32 0.5, %v1755_v8 }
0x1467   :  { %v3050_v25 = vadd.f32 0.5, %v1655_v14 }
0x1468   :  { %v1758_v61 = vmul.f32 %v1756_v11, %v1556_v36 }
0x1469   :  { %v1658_v1 = vmul.f32 %v3050_v25, %v1456_v39 }
0x14d1   :  { %v1761_v5 = vpop.permute.xlu0 %1760 }
0x14d2   :  { %v1763_v9 = vmul.f32 %v1761_v5, %v1756_v11 }
0x14d4   :  { %1765 = vrot.lane.b32.xlu0 %v1763_v9, %s2594_s2 }
0x14d5   :  { %v1661_v58 = vpop.permute.xlu1 %1660 }
0x14d6   :  { %v1663_v12 = vmul.f32 %v1661_v58, %v3050_v25 }
0x14d8   :  { %1665 = vrot.lane.b32.xlu1 %v1663_v12, %s2594_s2 }
0x14dc   :  { %506 = vrot.lane.b32.xlu1 %v2809_v41, %s2594_s2 }
0x14e0   :  { %934 = vrot.lane.b32.xlu1 %v2909_v22, %s2594_s2 }
0x14e4   :  { %1358 = vrot.lane.b32.xlu1 %v2995_v4, %s2594_s2 }
0x1546   :  { %v1766_v15 = vpop.permute.xlu0 %1765 }
0x1547   :  { %v1768_v17 = vadd.f32 %v1766_v15, %v1758_v61 }
0x1549   :  { %2487 = vtanh.f32 %v1768_v17 }
0x154a   :  { %v1666_v13 = vpop.permute.xlu1 %1665 }
0x154b   :  { %v1668_v0 = vadd.f32 %v1666_v13, %v1658_v1 }
0x154d   :  { %2489 = vtanh.f32 %v1668_v0 }
0x154e   :  { %v507_v18 = vpop.permute.xlu1 %506 }
0x154f   :  { %510 = vst.msk [vmem:[#allocation3 + $0x30] sm:$0xff] %vm289_vm3, %v507_v18 }
0x1552   :  { %v935_v41 = vpop.permute.xlu1 %934 }
0x1553   :  { %v2488_v20 = vpop.eup %2487  ;;  %938 = vst.msk [vmem:[#allocation3 + $0x20] sm:$0xff] %vm289_vm3, %v935_v41 }
0x1554   :  { %1771 = vrot.lane.b32.xlu0 %v2488_v20, %s2593_s9 }
0x1556   :  { %v1359_v22 = vpop.permute.xlu1 %1358  ;;  %v1800_v50 = vld [vmem:[#allocation3 + $0x30] sm:$0xff] }
0x1557   :  { %v2490_v4 = vpop.eup %2489  ;;  %1362 = vst.msk [vmem:[#allocation3 + $0x10] sm:$0xff] %vm289_vm3, %v1359_v22 }
0x1558   :  { %292 = vrot.lane.b32.xlu0 %v2759_v55, %s2594_s2  ;;  %1671 = vrot.lane.b32.xlu1 %v2490_v4, %s2593_s9 }
0x155c   :  { %720 = vrot.lane.b32.xlu0 %v2859_v31, %s2594_s2  ;;  %v1798_v31 = vld [vmem:[#allocation3 + $0x20] sm:$0xff] }
0x155e   :  { %v1796_v55 = vld [vmem:[#allocation3 + $0x10] sm:$0xff] }
0x1560   :  { %1146 = vrot.lane.b32.xlu0 %v2955_v10, %s2594_s2 }
0x1564   :  { %1570 = vrot.lane.b32.xlu0 %v3031_v46, %s2594_s2 }
0x1568   :  { %286 = vrot.lane.b32.xlu0 %v2763_v57, %s2594_s2 }
0x156c   :  { %714 = vrot.lane.b32.xlu0 %v2863_v33, %s2594_s2 }
0x1570   :  { %1140 = vrot.lane.b32.xlu0 %v2959_v16, %s2594_s2 }
0x1574   :  { %1564 = vrot.lane.b32.xlu0 %v3035_v49, %s2594_s2 }
0x1578   :  { %1814 = vrot.lane.b32.xlu0 %v1796_v55, %s2594_s2 }
0x157c   :  { %1818 = vrot.lane.b32.xlu0 %v1798_v31, %s2594_s2 }
0x15c6   :  { %v1772_v10 = vpop.permute.xlu0 %1771 }
0x15c7   :  { %v1774_v23 = vmul.f32 %v1772_v10, %v1756_v11 }
0x15c9   :  { %1782 = vrot.lane.b32.xlu1 %v1774_v23, %s2594_s2 }
0x15ca   :  { %v293_v57 = vpop.permute.xlu0 %292  ;;  %v1672_v27 = vpop.permute.xlu1 %1671 }
0x15cb   :  { %296 = vst.msk [vmem:[#allocation3 + $0x38] sm:$0xff] %vm289_vm3, %v293_v57 }
0x15cd   :  { %500 = vrot.lane.b32.xlu1 %v2813_v43, %s2594_s2 }
0x15ce   :  { %v721_v33 = vpop.permute.xlu0 %720 }
0x15cf   :  { %724 = vst.msk [vmem:[#allocation3 + $0x28] sm:$0xff] %vm289_vm3, %v721_v33 }
0x15d1   :  { %928 = vrot.lane.b32.xlu1 %v2913_v28, %s2594_s2 }
0x15d2   :  { %v1147_v16 = vpop.permute.xlu0 %1146  ;;  %v1801_v39 = vld [vmem:[#allocation3 + $0x38] sm:$0xff] }
0x15d3   :  { %1150 = vst.msk [vmem:[#allocation3 + $0x18] sm:$0xff] %vm289_vm3, %v1147_v16 }
0x15d5   :  { %1352 = vrot.lane.b32.xlu1 %v2999_v7, %s2594_s2  ;;  %v1674_v7 = vmul.f32 %v1672_v27, %v3050_v25 }
0x15d6   :  { %v1571_v26 = vpop.permute.xlu0 %1570  ;;  %v1799_v35 = vld [vmem:[#allocation3 + $0x28] sm:$0xff] }
0x15d7   :  { %1574 = vst.msk [vmem:[#allocation3 + $0x8] sm:$0xff] %vm289_vm3, %v1571_v26 }
0x15da   :  { %v287_v44 = vpop.permute.xlu0 %286  ;;  %v1797_v29 = vld [vmem:[#allocation3 + $0x18] sm:$0xff] }
0x15db   :  { %290 = vst.msk [vmem:[#allocation2] sm:$0xff] %vm289_vm3, %v287_v44 }
0x15de   :  { %v715_v47 = vpop.permute.xlu0 %714  ;;  %v1795_v43 = vld [vmem:[#allocation3 + $0x8] sm:$0xff] }
0x15df   :  { %718 = vst.msk [vmem:[#allocation2 + $0x10] sm:$0xff] %vm289_vm3, %v715_v47  ;;  %1812 = vrot.lane.b32.xlu1 %v1795_v43, %s2594_s2 }
0x15e2   :  { %v1141_v28 = vpop.permute.xlu0 %1140  ;;  %v1786_v6 = vld [vmem:[#allocation2] sm:$0xff] }
0x15e3   :  { %1144 = vst.msk [vmem:[#allocation2 + $0x20] sm:$0xff] %vm289_vm3, %v1141_v28  ;;  %1816 = vrot.lane.b32.xlu1 %v1797_v29, %s2594_s2 }
0x15e6   :  { %v1565_v30 = vpop.permute.xlu0 %1564  ;;  %v1788_v32 = vld [vmem:[#allocation2 + $0x10] sm:$0xff] }
0x15e7   :  { %1568 = vst.msk [vmem:[#allocation2 + $0x30] sm:$0xff] %vm289_vm3, %v1565_v30  ;;  %1776 = vrot.lane.b32.xlu1 %v1674_v7, %s2594_s2 }
0x15ea   :  { %v1815_v34 = vpop.permute.xlu0 %1814  ;;  %v1790_v37 = vld [vmem:[#allocation2 + $0x20] sm:$0xff] }
0x15eb   :  { %v1836_v36 = vsel %vm289_vm3, %v1788_v32, %v1815_v34  ;;  %1820 = vrot.lane.b32.xlu1 %v1799_v35, %s2594_s2 }
0x15ec   :  { %1845 = vst.msk [vmem:[#allocation10 + $0x10] sm:$0xff] %vm1842_vm4, %v1836_v36 }
0x15ee   :  { %v1819_v38 = vpop.permute.xlu0 %1818  ;;  %v1792_v11 = vld [vmem:[#allocation2 + $0x30] sm:$0xff] }
0x15ef   :  { %v1838_v40 = vsel %vm289_vm3, %v1790_v37, %v1819_v38  ;;  %1824 = vrot.lane.b32.xlu1 %v1801_v39, %s2594_s2 }
0x15f0   :  { %1847 = vst.msk [vmem:[#allocation10 + $0x20] sm:$0xff] %vm1842_vm4, %v1838_v40 }
0x163b   :  { %v1783_v42 = vpop.permute.xlu1 %1782 }
0x163c   :  { %1785 = vst.msk [vmem:[#allocation3] sm:$0xff] %vm289_vm3, %v1783_v42 }
0x163f   :  { %v501_v45 = vpop.permute.xlu1 %500 }
0x1640   :  { %504 = vst.msk [vmem:[#allocation2 + $0x8] sm:$0xff] %vm289_vm3, %v501_v45 }
0x1643   :  { %v929_v46 = vpop.permute.xlu1 %928  ;;  %v1794_v48 = vld [vmem:[#allocation3] sm:$0xff] }
0x1644   :  { %932 = vst.msk [vmem:[#allocation2 + $0x18] sm:$0xff] %vm289_vm3, %v929_v46  ;;  %1810 = vrot.lane.b32.xlu0 %v1794_v48, %s2594_s2 }
0x1647   :  { %v1353_v49 = vpop.permute.xlu1 %1352  ;;  %v1787_v51 = vld [vmem:[#allocation2 + $0x8] sm:$0xff] }
0x1648   :  { %1356 = vst.msk [vmem:[#allocation2 + $0x28] sm:$0xff] %vm289_vm3, %v1353_v49  ;;  %1822 = vrot.lane.b32.xlu0 %v1800_v50, %s2594_s2 }
0x164b   :  { %v1789_v54 = vld [vmem:[#allocation2 + $0x18] sm:$0xff] }
0x164f   :  { %v1791_v62 = vld [vmem:[#allocation2 + $0x28] sm:$0xff] }
0x1651   :  { %v1813_v52 = vpop.permute.xlu1 %1812 }
0x1652   :  { %v1835_v53 = vsel %vm289_vm3, %v1787_v51, %v1813_v52 }
0x1653   :  { %1844 = vst.msk [vmem:[#allocation10 + $0x8] sm:$0xff] %vm1842_vm4, %v1835_v53 }
0x1655   :  { %v1817_v56 = vpop.permute.xlu1 %1816 }
0x1656   :  { %v1837_v59 = vsel %vm289_vm3, %v1789_v54, %v1817_v56 }
0x1657   :  { %1846 = vst.msk [vmem:[#allocation10 + $0x18] sm:$0xff] %vm1842_vm4, %v1837_v59 }
0x1659   :  { %v1777_v60 = vpop.permute.xlu1 %1776 }
0x165a   :  { %1780 = vst.msk [vmem:[#allocation2 + $0x38] sm:$0xff] %vm289_vm3, %v1777_v60 }
0x165d   :  { %v1821_v63 = vpop.permute.xlu1 %1820 }
0x165e   :  { %v1839_v3 = vsel %vm289_vm3, %v1791_v62, %v1821_v63 }
0x165f   :  { %1848 = vst.msk [vmem:[#allocation10 + $0x28] sm:$0xff] %vm1842_vm4, %v1839_v3 }
0x1661   :  { %v1793_v21 = vld [vmem:[#allocation2 + $0x38] sm:$0xff]  ;;  %v1825_v2 = vpop.permute.xlu1 %1824 }
0x1662   :  { %v1841_v19 = vsel %vm289_vm3, %v1793_v21, %v1825_v2 }
0x1663   :  { %1850 = vst.msk [vmem:[#allocation10 + $0x38] sm:$0xff] %vm1842_vm4, %v1841_v19 }
0x16b6   :  { %v1811_v8 = vpop.permute.xlu0 %1810 }
0x16b7   :  { %v1834_v24 = vsel %vm289_vm3, %v1786_v6, %v1811_v8 }
0x16b8   :  { %1843 = vst.msk [vmem:[#allocation10] sm:$0xff] %vm1842_vm4, %v1834_v24 }
0x16ba   :  { %v1823_v14 = vpop.permute.xlu0 %1822 }
0x16bb   :  { %v1840_v5 = vsel %vm289_vm3, %v1792_v11, %v1823_v14 }
0x16bc   :  { %1849 = vst.msk [vmem:[#allocation10 + $0x30] sm:$0xff] %vm1842_vm4, %v1840_v5 }
0x16bd   :  { %2568 = shalt.err (!%p2565_p0)
}
0x16be   :  { %s2569_s15 = scalar_lea.hbm %s3148_s5, 1024 }
0x16bf   :  { %p2570_p1 = scmp.ne.s32.totalorder %s3148_s5, %s2569_s15  ;;  %p2573_p2 = scmp.lt.u32.totalorder %s2569_s15, %s3148_s5 }
0x16c1   :  { %p2575_p3 = pnand %p2573_p2, %p2570_p1 }
0x16c3   :  { %2578 = shalt.err (!%p2575_p3)
}
0x16c4   :  { %1862 = dma.vmem_to_hbm [thread:$0]  %s1857_s11, 1024, %s3148_s5, [#allocation6], %s2587_s30, %s2587_s30, %s2588_s6  }
0x16c5   :  { %2583 = dma.done.wait [#allocation6], 1024  }
0x16c6   :  { %2584 = vsyncadd [#allocation6], 4294966272 }
0x16c7   :  { %1866 = vsyncpa [#allocation5], 1 }
0x16c8   :  { %1867 = vsyncpa [#allocation8], 1 }
0x16c9   :  { %1868 = vsyncpa [#allocation6], 1 }

</bundles_post_ra>
